<compile_context>
chip_gen: v7x
topology: tpu7x:2x2x1
jax: 0.10.0
libtpu: 0.0.40
codegen_flags: <defaults>
</compile_context>

<pallas_src>
import functools
import numpy as np
import jax
import jax.numpy as jnp
from jax.experimental import pallas as pl
from jax.experimental.pallas import tpu as pltpu


def _rff_kernel(coords_ref, proj_ref, out_ref, *, sigma, out_scale,
                num_frequencies):
    # coords_ref: (tm, in_features)   proj_ref: (in_features, F)
    # out_ref:    (tm, 2*F)  with [:, :F] = sin, [:, F:] = cos
    F = num_frequencies
    p = proj_ref[...].astype(jnp.float32)
    if sigma != 1.0:                      # static (trace-time) check
        p = p * jnp.float32(sigma)
    pos_enc = jnp.dot(
        coords_ref[...].astype(jnp.float32),
        p,
        preferred_element_type=jnp.float32,
    )
    c = jnp.float32(out_scale)
    # Direct half-writes: both halves are 128-lane aligned -> unmasked stores.
    out_ref[:, :F] = (jnp.sin(pos_enc) * c).astype(out_ref.dtype)
    out_ref[:, F:] = (jnp.cos(pos_enc) * c).astype(out_ref.dtype)


def _round_up(x, m):
    return ((x + m - 1) // m) * m


def rand_fourier_feature(coords, proj, *, sigma=1.0, scale=80.0,
                         num_frequencies=128, tile_m=1024, out_dtype=None):
    """coords: (B, N, in_features), proj: (in_features, num_frequencies)."""
    B, N, in_features = coords.shape
    M = B * N
    out_features = 2 * num_frequencies
    if out_dtype is None:
        out_dtype = coords.dtype

    out_scale = float(scale) / float(np.sqrt(num_frequencies)) if scale != -1 else 1.0

    coords2d = coords.reshape(M, in_features)

    # Row tile: multiple of 8 (sublane granularity), clamped for small inputs.
    tile_m_eff = max(8, min(_round_up(tile_m, 8), _round_up(M, 8)))
    grid_m = pl.cdiv(M, tile_m_eff)

    # Pad only the tiny input up to a whole number of tiles so input DMAs are
    # never ragged (<= (tile_m-1) * in_features * 4 bytes, negligible).
    M_in = grid_m * tile_m_eff
    if M_in != M:
        coords2d = jnp.pad(coords2d, ((0, M_in - M), (0, 0)))

    kernel = functools.partial(
        _rff_kernel,
        sigma=float(sigma),
        out_scale=out_scale,
        num_frequencies=num_frequencies,
    )

    out2d = pl.pallas_call(
        kernel,
        # Exact row count: the last (ragged) output block's out-of-bounds rows
        # are dropped by the pipeline -> no output padding / post-slice copy.
        out_shape=jax.ShapeDtypeStruct((M, out_features), out_dtype),
        grid_spec=pltpu.PrefetchScalarGridSpec(
            num_scalar_prefetch=0,
            grid=(grid_m,),
            in_specs=[
                # rows tiled; in_features kept whole (small, e.g. 3)
                pl.BlockSpec((tile_m_eff, in_features), lambda i: (i, 0)),
                # proj is tiny -> fully resident each step
                pl.BlockSpec((in_features, num_frequencies), lambda i: (0, 0)),
            ],
            out_specs=pl.BlockSpec((tile_m_eff, out_features), lambda i: (i, 0)),
        ),
        compiler_params=pltpu.CompilerParams(
            dimension_semantics=("parallel",),
            # At tile_m=1024: coords (lane-padded) ~1 MiB + out ~2 MiB across
            # double buffers; well inside the default scoped VMEM on
            # v5e/v6e/v7x. Raise vmem_limit_bytes only if pushing tile_m >~4K.
        ),
    )(coords2d, proj)

    return out2d.reshape(B, N, out_features)


def make_proj(in_features, num_frequencies, range_=2.0, seed=0):
    # Deterministic stand-in for torch.randn * (2*pi/range)  (synthetic init).
    key = jax.random.PRNGKey(seed)
    return (jax.random.normal(key, (in_features, num_frequencies), dtype=jnp.float32)
            * (2.0 * np.pi / range_))


def reference(coords, proj, sigma, scale, num_frequencies):
    B, N, _ = coords.shape
    pos_enc = coords.reshape(B * N, -1) @ (proj * sigma)
    enc = jnp.concatenate([jnp.sin(pos_enc), jnp.cos(pos_enc)], axis=-1)
    out = enc.reshape(B, N, 2 * num_frequencies)
    if scale != -1:
        out = out * (scale / np.sqrt(num_frequencies))
    return out


if __name__ == "__main__":
    in_features = 3
    num_frequencies = 128
    sigma = 1.0
    scale = 80.0
    range_ = 2.0

    B, N = 2, 64  # B*N = 128 rows (small test shape)

    key = jax.random.PRNGKey(0)
    kc, _ = jax.random.split(key)
    coords = jax.random.uniform(kc, (B, N, in_features), dtype=jnp.float32,
                                minval=-1.0, maxval=1.0)
    proj = make_proj(in_features, num_frequencies, range_=range_, seed=0)

    out = rand_fourier_feature(coords, proj, sigma=sigma, scale=scale,
                               num_frequencies=num_frequencies)
    out = jax.block_until_ready(out)

    ref = reference(coords, proj, sigma, scale, num_frequencies)
    np.testing.assert_allclose(np.asarray(out), np.asarray(ref),
                               rtol=1e-5, atol=1e-5)
    assert out.shape == (B, N, 2 * num_frequencies)

    # Also exercise a row count that is neither a multiple of 8 nor of the
    # tile (validates the ragged-output / padded-input path).
    B2, N2 = 3, 37  # 111 rows
    coords2 = jax.random.uniform(jax.random.PRNGKey(1), (B2, N2, in_features),
                                 dtype=jnp.float32, minval=-1.0, maxval=1.0)
    out2 = jax.block_until_ready(
        rand_fourier_feature(coords2, proj, sigma=sigma, scale=scale,
                             num_frequencies=num_frequencies))
    ref2 = reference(coords2, proj, sigma, scale, num_frequencies)
    np.testing.assert_allclose(np.asarray(out2), np.asarray(ref2),
                               rtol=1e-5, atol=1e-5)

    # Non-unit sigma path (exercises in-kernel sigma fold).
    out3 = jax.block_until_ready(
        rand_fourier_feature(coords, proj, sigma=0.5, scale=scale,
                             num_frequencies=num_frequencies))
    ref3 = reference(coords, proj, 0.5, scale, num_frequencies)
    np.testing.assert_allclose(np.asarray(out3), np.asarray(ref3),
                               rtol=1e-5, atol=1e-5)

    print("KERNEL_OK")
</pallas_src>

<mosaic_0001>
module attributes {stable_mosaic.version = 11 : i64} {
  func.func @_rff_kernel(%arg0: i32, %arg1: memref<128x3xf32, #tpu.memory_space<vmem>>, %arg2: memref<3x128xf32, #tpu.memory_space<vmem>>, %arg3: memref<128x256xf32, #tpu.memory_space<vmem>>) attributes {dimension_semantics = [#tpu.dimension_semantics<parallel>], iteration_bounds = array<i64: 1>, scalar_prefetch = 0 : i64, scratch_operands = 0 : i64, tpu.core_type = #tpu.core_type<tc>, window_params = [{transform_indices = @transform_0, window_bounds = array<i64: 128, 3>}, {pipeline_mode = #tpu.pipeline_mode<synchronous>, transform_indices = @transform_1, window_bounds = array<i64: 3, 128>}, {transform_indices = @transform_2, window_bounds = array<i64: 128, 256>}]} {
    %c0 = arith.constant 0 : index
    %c0_0 = arith.constant 0 : index
    %0 = vector.load %arg2[%c0, %c0_0] : memref<3x128xf32, #tpu.memory_space<vmem>>, vector<3x128xf32>
    %c0_1 = arith.constant 0 : index
    %c0_2 = arith.constant 0 : index
    %1 = vector.load %arg1[%c0_1, %c0_2] : memref<128x3xf32, #tpu.memory_space<vmem>>, vector<128x3xf32>
    %cst = arith.constant dense<0.000000e+00> : vector<128x128xf32>
    %2 = tpu.matmul %1, %0, %cst {dimension_numbers = #tpu.dot_dimension_numbers<[1], [0], [0], [1], [0, 0, 1, 1], [], []>} : vector<128x3xf32>, vector<3x128xf32>, vector<128x128xf32> -> vector<128x128xf32>
    %3 = math.sin %2 : vector<128x128xf32>
    %cst_3 = arith.constant 7.07106781 : f32
    %4 = vector.broadcast %cst_3 : f32 to vector<128x128xf32>
    %5 = arith.mulf %3, %4 : vector<128x128xf32>
    %c0_4 = arith.constant 0 : index
    %c0_5 = arith.constant 0 : index
    %6 = vector.load %arg3[%c0_4, %c0_5] : memref<128x256xf32, #tpu.memory_space<vmem>>, vector<128x128xf32>
    tpu.vector_store %arg3[%c0_4, %c0_5], %5 {strides = array<i32>} : memref<128x256xf32, #tpu.memory_space<vmem>>, vector<128x128xf32>,
    %7 = math.cos %2 : vector<128x128xf32>
    %cst_6 = arith.constant 7.07106781 : f32
    %8 = vector.broadcast %cst_6 : f32 to vector<128x128xf32>
    %9 = arith.mulf %7, %8 : vector<128x128xf32>
    %c0_7 = arith.constant 0 : index
    %c128 = arith.constant 128 : index
    %10 = vector.load %arg3[%c0_7, %c128] : memref<128x256xf32, #tpu.memory_space<vmem>>, vector<128x128xf32>
    tpu.vector_store %arg3[%c0_7, %c128], %9 {strides = array<i32>} : memref<128x256xf32, #tpu.memory_space<vmem>>, vector<128x128xf32>,
    return
  }
  func.func @transform_0(%arg0: i32) -> (i32, i32) {
    %c0_i32 = arith.constant 0 : i32
    %c0_i32_0 = arith.constant 0 : i32
    return %arg0, %c0_i32 : i32, i32
  }
  func.func @transform_1(%arg0: i32) -> (i32, i32) {
    %c0_i32 = arith.constant 0 : i32
    %c0_i32_0 = arith.constant 0 : i32
    %c0_i32_1 = arith.constant 0 : i32
    return %c0_i32, %c0_i32_0 : i32, i32
  }
  func.func @transform_2(%arg0: i32) -> (i32, i32) {
    %c0_i32 = arith.constant 0 : i32
    %c0_i32_0 = arith.constant 0 : i32
    return %arg0, %c0_i32 : i32, i32
  }
}

</mosaic_0001>

<bundles_post_ra>
// kernel: tpu_custom_call.1
= control target key start
LH: loop header
LB: loop body
LE: loop exit
PB: predicated region body
PF: predicated region fallthrough
CT: control target
= control target key end

     0   :  { %vm78_vm0 = vcmask 1042432   ;;  %vm29_vm1 = vcmask 23552   ;;  %s5610_s0 = inlined_call_operand.vmem [shape: f32[128,3], index: 0, kind: input, shape index: {}]   ;;  %s5611_s1 = inlined_call_operand.vmem [shape: f32[3,128], index: 1, kind: input, shape index: {}]   ;;  %s5612_s2 = inlined_call_operand.hbm [shape: f32[128,256], index: 2, kind: output, shape index: {}]  }
   0x1   :  { %v12_v0 = vld [vmem:[%s5611_s1] sm:$0x7]  ;;  %v14_v3 = vld [vmem:[%s5610_s0 + $0x8] sm:$0xff]  ;;  %v15_v5 = vld [vmem:[%s5610_s0 + $0x10] sm:$0xff] }
   0x2   :  { %v13_v1 = vld [vmem:[%s5610_s0] sm:$0xff]  ;;  %3781 = vmatprep.subr.msk.mxu0 %vm78_vm0, %v12_v0  ;;  %3807 = vmatprep.subr.msk.mxu1 %vm78_vm0, %v12_v0  ;;  %v22_v4 = vld [vmem:[%s5610_s0 + $0x48] sm:$0xff]  ;;  %v23_v6 = vld [vmem:[%s5610_s0 + $0x50] sm:$0xff] }
   0x3   :  { %v21_v2 = vld [vmem:[%s5610_s0 + $0x40] sm:$0xff]  ;;  %3782 = vmatpush3.msk.msra.mxu0 %vm78_vm0, %v12_v0  ;;  %3808 = vmatpush3.msk.msra.mxu1 %vm78_vm0, %v12_v0  ;;  %v16_v7 = vld [vmem:[%s5610_s0 + $0x18] sm:$0xff] }
   0x4   :  { %3783 = vmatprep.mubr.msk.f32.mxu0 %vm29_vm1, %v13_v1  ;;  %3795 = vmatprep.mubr.msk.f32.mxu1 %vm29_vm1, %v21_v2  ;;  %v24_v8 = vld [vmem:[%s5610_s0 + $0x58] sm:$0xff] }
   0x5   :  { %3784 = vmatmul.mubr.msk.f32.vlgmr.msra.gmra.mrb[0].mxu0 %vm29_vm1, %v14_v3  ;;  %3796 = vmatmul.mubr.msk.f32.vlgmr.msra.gmra.mrb[0].mxu1 %vm29_vm1, %v22_v4 }
   0x6   :  { %3786 = vmatprep.mubr.msk.f32.mxu0 %vm29_vm1, %v15_v5  ;;  %3798 = vmatprep.mubr.msk.f32.mxu1 %vm29_vm1, %v23_v6 }
   0x7   :  { %7 = vsyncpa [#allocation3], 0  ;;  %v17_v9 = vld [vmem:[%s5610_s0 + $0x20] sm:$0xff]  ;;  %v18_v11 = vld [vmem:[%s5610_s0 + $0x28] sm:$0xff]  ;;  %v3970_v50 = vmov 683565275  }
   0x8   :  { %v25_v10 = vld [vmem:[%s5610_s0 + $0x60] sm:$0xff]  ;;  %v26_v12 = vld [vmem:[%s5610_s0 + $0x68] sm:$0xff]  ;;  %v19_v13 = vld [vmem:[%s5610_s0 + $0x30] sm:$0xff]  ;;  %v3971_v54 = vmov 2475754826  }
   0x9   :  { %3787 = vmatmul.mubr.msk.f32.gmra.mrb[2].mxu0 %vm29_vm1, %v16_v7  ;;  %3799 = vmatmul.mubr.msk.f32.gmra.mrb[2].mxu1 %vm29_vm1, %v24_v8  ;;  %v27_v14 = vld [vmem:[%s5610_s0 + $0x70] sm:$0xff]  ;;  %v20_v15 = vld [vmem:[%s5610_s0 + $0x38] sm:$0xff]  ;;  %v3972_v56 = vmov 2131351028   ;;  %v3973_v58 = vmov 2102212464  }
   0xa   :  { %3789 = vmatprep.mubr.msk.f32.mxu0 %vm29_vm1, %v17_v9  ;;  %3801 = vmatprep.mubr.msk.f32.mxu1 %vm29_vm1, %v25_v10  ;;  %v28_v16 = vld [vmem:[%s5610_s0 + $0x78] sm:$0xff]  ;;  %v3974_v60 = vmov 920167782   ;;  %v3975_v3 = vmov 1326507024   ;;  %s3976_s0 = smov [#allocation2]  }
   0xb   :  { %s3608_s14 = sshll.u32 %s3976_s0, 4  ;;  %s3609_s14 = int_to_ptr.vmem [resolvable:$true] %s3608_s14 }
   0xc   :  { %s3946_s15 = scalar_lea.vmem %s3609_s14, 4096  ;;  %p3951_p1 = scmp.lt.s32.totalorder %s3609_s14, %s3609_s14 }
   0xd   :  { %3790 = vmatmul.mubr.msk.f32.gmra.mrb[4].mxu0 %vm29_vm1, %v18_v11  ;;  %3802 = vmatmul.mubr.msk.f32.gmra.mrb[4].mxu1 %vm29_vm1, %v26_v12  ;;  %p3947_p0 = scmp.ne.s32.totalorder %s3609_s14, %s3946_s15  ;;  %p3952_p2 = scmp.lt.s32.totalorder %s3946_s15, %s3946_s15 }
   0xe   :  { %3792 = vmatprep.mubr.msk.f32.mxu0 %vm29_vm1, %v19_v13  ;;  %3804 = vmatprep.mubr.msk.f32.mxu1 %vm29_vm1, %v27_v14 }
   0xf   :  { %p3953_p3 = por %p3952_p2, %p3951_p1 }
  0x11   :  { %3793 = vmatmul.mubr.msk.f32.gmra.mrb[6].mxu0 %vm29_vm1, %v20_v15  ;;  %3805 = vmatmul.mubr.msk.f32.gmra.mrb[6].mxu1 %vm29_vm1, %v28_v16  ;;  %p3954_p4 = pnand %p3953_p3, %p3947_p0 }
  0xd8   :  { %v4061_v17 = vpop.f32.mrb[0].mxu0  ;;  %v4063_v18 = vpop.f32.mrb[0].mxu1 }
  0xd9   :  { %v331_v19 = vand.u32 2147483647, %v4061_v17  ;;  %v334_v20 = vand.u32 2139095040, %v4061_v17  ;;  %v4067_v21 = vpop.f32.mrb[1].mxu0  ;;  %v4069_v22 = vpop.f32.mrb[1].mxu1  ;;  %v1166_v24 = vand.u32 2139095040, %v4063_v18 }
  0xda   :  { %v1163_v23 = vand.u32 2147483647, %v4063_v18  ;;  %v230_v29 = vand.u32 2139095040, %v4067_v21  ;;  %v227_v47 = vand.u32 2147483647, %v4067_v21  ;;  %vm333_vm15 = vcmp.lt.s32.totalorder %v4061_v17, 0 }
  0xdb   :  { %v335_v25 = vshrl.u32 %v334_v20, 23  ;;  %v338_v26 = vand.u32 8388607, %v331_v19  ;;  %v1167_v27 = vshrl.u32 %v1166_v24, 23  ;;  %vm4183_vm1 = vcmp.le.f32.partialorder %v331_v19, 0.7853982 }
  0xdc   :  { %v1170_v28 = vand.u32 8388607, %v1163_v23  ;;  %v4078_v31 = vpop.f32.mrb[2].mxu0  ;;  %v4080_v32 = vpop.f32.mrb[2].mxu1  ;;  %v231_v34 = vshrl.u32 %v230_v29, 23 }
  0xdd   :  { %v3640_v30 = vadd.s32 4294967169, %v335_v25  ;;  %v3672_v33 = vadd.s32 4294967169, %v1167_v27  ;;  %v4082_v35 = vpop.f32.mrb[3].mxu0  ;;  %v339_v37 = vor.u32 8388608, %v338_v26  ;;  %v4107_v15 = vpop.f32.mrb[3].mxu1 }
  0xde   :  { %v1171_v38 = vor.u32 8388608, %v1170_v28  ;;  %v3636_v40 = vadd.s32 4294967169, %v231_v34 }
  0xdf   :  { %v341_v36 = vadd.s32 1, %v3640_v30  ;;  %v1173_v39 = vadd.s32 1, %v3672_v33  ;;  %v4084_v45 = vshll.u32 %v339_v37, 8 }
  0xe0   :  { %v4086_v46 = vshll.u32 %v1171_v38, 8  ;;  %v4089_v48 = vadd.s32 1, %v3636_v40 }
  0xe1   :  { %vm342_vm2 = vcmp.gt.s32.totalorder %v341_v36, 0  ;;  %vm1174_vm3 = vcmp.gt.s32.totalorder %v1173_v39, 0 }
  0xe2   :  { %v343_v41 = vsel %vm342_vm2, %v341_v36, 0  ;;  %v1175_v44 = vsel %vm1174_vm3, %v1173_v39, 0  ;;  %vm238_vm8 = vcmp.gt.s32.totalorder %v4089_v48, 0  ;;  %vm1165_vm2 = vcmp.lt.s32.totalorder %v4063_v18, 0 }
  0xe3   :  { %v344_v42 = vshrl.u32 %v343_v41, 5  ;;  %v345_v43 = vand.u32 31, %v343_v41  ;;  %v4092_v52 = vshrl.u32 %v1175_v44, 5  ;;  %v1177_v53 = vand.u32 31, %v1175_v44 }
  0xe5   :  { %v346_v49 = vsub.s32 32, %v345_v43  ;;  %v348_v51 = vshll.u32 %v3970_v50, %v345_v43  ;;  %v351_v55 = vshll.u32 %v3971_v54, %v345_v43  ;;  %v354_v57 = vshll.u32 %v3972_v56, %v345_v43 }
  0xe6   :  { %v357_v59 = vshll.u32 %v3973_v58, %v345_v43  ;;  %v360_v61 = vshll.u32 %v3974_v60, %v345_v43  ;;  %vm363_vm4 = vcmp.lt.s32.totalorder %v344_v42, 1  ;;  %vm364_vm5 = vcmp.lt.s32.totalorder %v344_v42, 2 }
  0xe7   :  { %v349_v62 = vshrl.u32 %v3971_v54, %v346_v49  ;;  %v352_v63 = vshrl.u32 %v3972_v56, %v346_v49  ;;  %v355_v0 = vshrl.u32 %v3973_v58, %v346_v49  ;;  %v347_v1 = vshrl.u32 %v3970_v50, %v346_v49 }
  0xe8   :  { %v358_v2 = vshrl.u32 %v3974_v60, %v346_v49  ;;  %v361_v4 = vshrl.u32 %v3975_v3, %v346_v49  ;;  %v1178_v8 = vsub.s32 32, %v1177_v53  ;;  %vm365_vm6 = vcmp.lt.s32.totalorder %v344_v42, 3 }
  0xe9   :  { %v350_v5 = vor.u32 %v349_v62, %v348_v51  ;;  %v353_v6 = vor.u32 %v352_v63, %v351_v55  ;;  %v356_v7 = vor.u32 %v355_v0, %v354_v57  ;;  %vm366_vm7 = vcmp.lt.s32.totalorder %v344_v42, 4 }
  0xea   :  { %v359_v9 = vor.u32 %v358_v2, %v357_v59  ;;  %v362_v10 = vor.u32 %v361_v4, %v360_v61  ;;  %v1180_v25 = vshll.u32 %v3970_v50, %v1177_v53  ;;  %v1181_v28 = vshrl.u32 %v3971_v54, %v1178_v8 }
  0xeb   :  { %v367_v11 = vsel %vm363_vm4, %v347_v1, %v350_v5  ;;  %v368_v12 = vsel %vm366_vm7, %v356_v7, 2102212464  ;;  %v371_v13 = vsel %vm363_vm4, %v350_v5, %v353_v6  ;;  %v375_v14 = vsel %vm363_vm4, %v353_v6, %v356_v7 }
  0xec   :  { %v369_v16 = vsel %vm365_vm6, %v353_v6, %v368_v12  ;;  %v372_v20 = vsel %vm366_vm7, %v359_v9, 920167782  ;;  %v376_v24 = vsel %vm366_vm7, %v362_v10, 1326507024  ;;  %v1183_v29 = vshll.u32 %v3971_v54, %v1177_v53 }
  0xed   :  { %v373_v26 = vsel %vm365_vm6, %v356_v7, %v372_v20  ;;  %v377_v27 = vsel %vm365_vm6, %v359_v9, %v376_v24  ;;  %v370_v30 = vsel %vm364_vm5, %v367_v11, %v369_v16  ;;  %v1184_v36 = vshrl.u32 %v3972_v56, %v1178_v8 }
  0xee   :  { %v374_v33 = vsel %vm364_vm5, %v371_v13, %v373_v26  ;;  %v378_v34 = vsel %vm364_vm5, %v375_v14, %v377_v27  ;;  %v1182_v41 = vor.u32 %v1181_v28, %v1180_v25  ;;  %v1186_v44 = vshll.u32 %v3972_v56, %v1177_v53 }
  0xef   :  { %v4118_v37 = vmul.u32.u64.low %v4084_v45, %v378_v34  ;;  %v4119_v38 = vmul.u32.u64.high %v4084_v45, %v378_v34, %v4118_v37  ;;  %v4122_v39 = vmul.u32.u64.low %v4084_v45, %v374_v33  ;;  %v4123_v40 = vmul.u32.u64.high %v4084_v45, %v374_v33, %v4122_v39 }
  0xf0   :  { %v1185_v43 = vor.u32 %v1184_v36, %v1183_v29  ;;  %v1187_v49 = vshrl.u32 %v3973_v58, %v1178_v8  ;;  %v1179_v51 = vshrl.u32 %v3970_v50, %v1178_v8  ;;  %v1189_v42 = vshll.u32 %v3973_v58, %v1177_v53 }
  0xf1   :  { %v1190_v55 = vshrl.u32 %v3974_v60, %v1178_v8  ;;  %v1193_v57 = vshrl.u32 %v3975_v3, %v1178_v8  ;;  %v386_v59 = vmul.u32 %v4084_v45, %v370_v30  ;;  %v1192_v62 = vshll.u32 %v3974_v60, %v1177_v53 }
  0xf2   :  { %v1188_v61 = vor.u32 %v1187_v49, %v1186_v44  ;;  %vm1195_vm9 = vcmp.lt.s32.totalorder %v4092_v52, 1  ;;  %vm388_vm10 = vc.u32 %v4119_v38, %v4122_v39  ;;  %v389_v63 = vadd.s32 1, %v4123_v40 }
  0xf3   :  { %v1191_v0 = vor.u32 %v1190_v55, %v1189_v42  ;;  %vm1196_vm11 = vcmp.lt.s32.totalorder %v4092_v52, 2  ;;  %v1194_v1 = vor.u32 %v1193_v57, %v1192_v62  ;;  %vm1197_vm12 = vcmp.lt.s32.totalorder %v4092_v52, 3 }
  0xf4   :  { %vm1198_vm13 = vcmp.lt.s32.totalorder %v4092_v52, 4  ;;  %v1203_v2 = vsel %vm1195_vm9, %v1182_v41, %v1185_v43  ;;  %v390_v45 = vsel %vm388_vm10, %v389_v63, %v4123_v40  ;;  %v1207_v53 = vsel %vm1195_vm9, %v1185_v43, %v1188_v61 }
  0xf5   :  { %v1200_v4 = vsel %vm1198_vm13, %v1188_v61, 2102212464  ;;  %v1204_v5 = vsel %vm1198_vm13, %v1191_v0, 920167782  ;;  %v391_v6 = vadd.s32 %v390_v45, %v386_v59  ;;  %v1199_v7 = vsel %vm1195_vm9, %v1179_v51, %v1182_v41 }
  0xf6   :  { %v1205_v8 = vsel %vm1197_vm12, %v1188_v61, %v1204_v5  ;;  %v1208_v9 = vsel %vm1198_vm13, %v1194_v1, 1326507024  ;;  %v1201_v10 = vsel %vm1197_vm12, %v1185_v43, %v1200_v4  ;;  %v239_v13 = vsel %vm238_vm8, %v4089_v48, 0 }
  0xf7   :  { %v1206_v11 = vsel %vm1196_vm11, %v1203_v2, %v1205_v8  ;;  %v1209_v12 = vsel %vm1197_vm12, %v1191_v0, %v1208_v9  ;;  %v392_v14 = vadd.s32 536870912, %v391_v6  ;;  %v1202_v28 = vsel %vm1196_vm11, %v1199_v7, %v1201_v10 }
  0xf8   :  { %v1210_v16 = vsel %vm1196_vm11, %v1207_v53, %v1209_v12  ;;  %v4148_v20 = vmul.u32.u64.low %v4086_v46, %v1206_v11  ;;  %v4149_v24 = vmul.u32.u64.high %v4086_v46, %v1206_v11, %v4148_v20  ;;  %v234_v29 = vand.u32 8388607, %v227_v47 }
  0xf9   :  { %v4152_v25 = vmul.u32.u64.low %v4086_v46, %v1210_v16  ;;  %v4153_v26 = vmul.u32.u64.high %v4086_v46, %v1210_v16, %v4152_v25  ;;  %v393_v27 = vshrl.u32 %v392_v14, 30  ;;  %v241_v48 = vand.u32 31, %v239_v13 }
  0xfa   :  { %v1062_v30 = vand.u32 2139095040, %v4069_v22  ;;  %v1221_v34 = vadd.s32 1, %v4149_v24  ;;  %v1218_v36 = vmul.u32 %v4086_v46, %v1202_v28  ;;  %v235_v41 = vor.u32 8388608, %v234_v29 }
  0xfb   :  { %v394_v33 = vshll.u32 %v393_v27, 30  ;;  %vm1220_vm14 = vc.u32 %v4153_v26, %v4148_v20  ;;  %v1059_v52 = vand.u32 2147483647, %v4069_v22  ;;  %v4167_v44 = vshrl.u32 %v239_v13, 5 }
  0xfc   :  { %v1222_v40 = vsel %vm1220_vm14, %v1221_v34, %v4149_v24  ;;  %v242_v49 = vsub.s32 32, %v241_v48  ;;  %v1063_v51 = vshrl.u32 %v1062_v30, 23  ;;  %v387_v46 = vadd.s32 %v4122_v39, %v4119_v38 }
  0xfd   :  { %v4163_v37 = vsub.s32 %v391_v6, %v394_v33  ;;  %v1223_v43 = vadd.s32 %v1222_v40, %v1218_v36  ;;  %v4173_v59 = vshll.u32 %v235_v41, 8  ;;  %v4177_v61 = vand.u32 8388607, %v1059_v52 }
  0xfe   :  { %v251_v63 = vshrl.u32 %v3973_v58, %v242_v49  ;;  %vm259_vm0 = vcmp.lt.s32.totalorder %v4167_v44, 1  ;;  %v3668_v0 = vadd.s32 4294967169, %v1063_v51  ;;  %v245_v39 = vshrl.u32 %v3971_v54, %v242_v49 }
  0xff   :  { %v397_v42 = vsub.s32 0, %v4163_v37  ;;  %v1224_v55 = vadd.s32 536870912, %v1223_v43  ;;  %v248_v2 = vshrl.u32 %v3972_v56, %v242_v49  ;;  %vm262_vm3 = vcmp.lt.s32.totalorder %v4167_v44, 4 }
 0x100   :  { %v417_v45 = vsub.s32 4, %v393_v27  ;;  %v250_v5 = vshll.u32 %v3972_v56, %v241_v48  ;;  %v254_v53 = vshrl.u32 %v3974_v60, %v242_v49  ;;  %vm261_vm4 = vcmp.lt.s32.totalorder %v4167_v44, 3 }
 0x101   :  { %v3641_v57 = vmin.u32 %v397_v42, %v4163_v37  ;;  %v1225_v62 = vshrl.u32 %v1224_v55, 30  ;;  %v244_v6 = vshll.u32 %v3970_v50, %v241_v48  ;;  %v247_v7 = vshll.u32 %v3971_v54, %v241_v48 }
 0x102   :  { %v253_v8 = vshll.u32 %v3973_v58, %v241_v48  ;;  %vm260_vm5 = vcmp.lt.s32.totalorder %v4167_v44, 2  ;;  %v1219_v9 = vadd.s32 %v4148_v20, %v4153_v26  ;;  %v252_v11 = vor.u32 %v251_v63, %v250_v5 }
 0x103   :  { %v399_v38 = vclz %v3641_v57  ;;  %v1226_v4 = vshll.u32 %v1225_v62, 30  ;;  %v257_v12 = vshrl.u32 %v3975_v3, %v242_v49  ;;  %v246_v13 = vor.u32 %v245_v39, %v244_v6 }
 0x104   :  { %v249_v14 = vor.u32 %v248_v2, %v247_v7  ;;  %v255_v16 = vor.u32 %v254_v53, %v253_v8  ;;  %v1249_v28 = vsub.s32 4, %v1225_v62  ;;  %v256_v29 = vshll.u32 %v3974_v60, %v241_v48 }
 0x105   :  { %v3642_v19 = vadd.s32 4294967294, %v399_v38  ;;  %v4199_v10 = vsub.s32 %v1223_v43, %v1226_v4  ;;  %v418_v20 = vsel %vm333_vm15, %v417_v45, %v393_v27  ;;  %v243_v26 = vshrl.u32 %v3970_v50, %v242_v49  ;;  %v4237_v4 = vpop.f32.mrb[4].mxu0 }
 0x106   :  { %vm4210_vm7 = vcmp.le.f32.partialorder %v1163_v23, 0.7853982  ;;  %v258_v41 = vor.u32 %v257_v12, %v256_v29  ;;  %v264_v48 = vsel %vm262_vm3, %v252_v11, 2102212464  ;;  %v267_v27 = vsel %vm259_vm0, %v246_v13, %v249_v14 }
 0x107   :  { %vm3643_vm6 = vcmp.lt.s32.totalorder %v3642_v19, 0  ;;  %v1229_v25 = vsub.s32 0, %v4199_v10  ;;  %v420_v23 = vsel %vm4183_vm1, 0, %v418_v20  ;;  %v1250_v42 = vsel %vm1165_vm2, %v1249_v28, %v1225_v62 }
 0x108   :  { %v402_v24 = vsel %vm3643_vm6, 0, %v3642_v19  ;;  %v263_v55 = vsel %vm259_vm0, %v243_v26, %v246_v13  ;;  %v271_v38 = vsel %vm259_vm0, %v249_v14, %v252_v11  ;;  %v265_v2 = vsel %vm261_vm4, %v249_v14, %v264_v48 }
 0x109   :  { %v403_v30 = vsub.s32 32, %v402_v24  ;;  %v407_v33 = vsub.s32 4294967266, %v402_v24  ;;  %v404_v34 = vshll.u32 %v4163_v37, %v402_v24  ;;  %v3673_v40 = vmin.u32 %v1229_v25, %v4199_v10 }
 0x10a   :  { %v268_v37 = vsel %vm262_vm3, %v255_v16, 920167782  ;;  %v272_v62 = vsel %vm262_vm3, %v258_v41, 1326507024  ;;  %v1069_v6 = vadd.s32 1, %v3668_v0  ;;  %v424_v29 = vadd.s32 3, %v420_v23 }
 0x10b   :  { %v405_v43 = vshrl.u32 %v387_v46, %v403_v30  ;;  %v408_v51 = vadd.s32 127, %v407_v33  ;;  %v1231_v49 = vclz %v3673_v40  ;;  %v269_v46 = vsel %vm261_vm4, %v252_v11, %v268_v37 }
 0x10c   :  { %v270_v45 = vsel %vm260_vm5, %v267_v27, %v269_v46  ;;  %v273_v19 = vsel %vm261_vm4, %v255_v16, %v272_v62  ;;  %v266_v16 = vsel %vm260_vm5, %v263_v55, %v265_v2  ;;  %vm1070_vm9 = vcmp.gt.s32.totalorder %v1069_v6, 0 }
 0x10d   :  { %v406_v57 = vor.u32 %v405_v43, %v404_v34  ;;  %v409_v63 = vshll.u32 %v408_v51, 23  ;;  %v3674_v39 = vadd.s32 4294967294, %v1231_v49  ;;  %v274_v7 = vsel %vm260_vm5, %v271_v38, %v273_v19 }
 0x10e   :  { %v4244_v8 = vmul.u32.u64.low %v4173_v59, %v270_v45  ;;  %v4245_v11 = vmul.u32.u64.high %v4173_v59, %v270_v45, %v4244_v8  ;;  %v4248_v14 = vmul.u32.u64.low %v4173_v59, %v274_v7  ;;  %v4249_v24 = vmul.u32.u64.high %v4173_v59, %v274_v7, %v4248_v14 }
 0x10f   :  { %v410_v5 = vor.u32 4788187, %v409_v63  ;;  %v413_v53 = vcvt.s32.f32 %v406_v57  ;;  %vm3675_vm8 = vcmp.lt.s32.totalorder %v3674_v39, 0  ;;  %v1252_v30 = vsel %vm4210_vm7, 0, %v1250_v42 }
 0x110   :  { %v1234_v13 = vsel %vm3675_vm8, 0, %v3674_v39  ;;  %v1071_v33 = vsel %vm1070_vm9, %v1069_v6, 0  ;;  %v285_v40 = vadd.s32 1, %v4245_v11  ;;  %v282_v48 = vmul.u32 %v4173_v59, %v266_v16 }
 0x111   :  { %v411_v12 = vand.u32 2147483647, %v410_v5  ;;  %v1235_v25 = vsub.s32 32, %v1234_v13  ;;  %v1239_v28 = vsub.s32 4294967266, %v1234_v13  ;;  %v1236_v20 = vshll.u32 %v4199_v10, %v1234_v13 }
 0x112   :  { %vm284_vm10 = vc.u32 %v4249_v24, %v4244_v8  ;;  %v1073_v44 = vand.u32 31, %v1071_v33  ;;  %v1256_v49 = vadd.s32 3, %v1252_v30  ;;  %v1067_v55 = vor.u32 8388608, %v4177_v61 }
 0x113   :  { %v414_v0 = vmul.f32 %v413_v53, %v411_v12  ;;  %v1237_v26 = vshrl.u32 %v1219_v9, %v1235_v25  ;;  %v1240_v34 = vadd.s32 127, %v1239_v28  ;;  %v286_v27 = vsel %vm284_vm10, %v285_v40, %v4245_v11 }
 0x114   :  { %v287_v42 = vadd.s32 %v286_v27, %v282_v48  ;;  %v1074_v59 = vsub.s32 32, %v1073_v44  ;;  %v4266_v57 = vand.u32 3, %v424_v29  ;;  %v4268_v63 = vand.u32 3, %v420_v23  ;;  %v4298_v29 = vpop.f32.mrb[4].mxu1 }
 0x115   :  { %v415_v41 = vxor.u32 2147483648, %v414_v0  ;;  %v1238_v43 = vor.u32 %v1237_v26, %v1236_v20  ;;  %v1241_v51 = vshll.u32 %v1240_v34, 23  ;;  %v4270_v2 = vand.u32 3, %v1256_v49 }
 0x116   :  { %v288_v46 = vadd.s32 536870912, %v287_v42  ;;  %v4272_v45 = vand.u32 3, %v1252_v30  ;;  %vm229_vm11 = vcmp.lt.s32.totalorder %v4067_v21, 0  ;;  %v1077_v61 = vshrl.u32 %v3971_v54, %v1074_v59 }
 0x117   :  { %v416_v37 = vsel %vm333_vm15, %v415_v41, %v414_v0  ;;  %v1242_v10 = vor.u32 4788187, %v1241_v51  ;;  %v1245_v39 = vcvt.s32.f32 %v1238_v43  ;;  %v1080_v5 = vshrl.u32 %v3972_v56, %v1074_v59 }
 0x118   :  { %v419_v9 = vsel %vm4183_vm1, %v4061_v17, %v416_v37  ;;  %v289_v62 = vshrl.u32 %v288_v46, 30  ;;  %v1086_v53 = vshrl.u32 %v3974_v60, %v1074_v59  ;;  %vm430_vm12 = vcmp.eq.s32.totalorder %v4266_v57, 2 }
 0x119   :  { %3882 = vcosq.f32 %v419_v9  ;;  %v1243_v38 = vand.u32 2147483647, %v1242_v10  ;;  %vm2124_vm13 = vcmp.eq.s32.totalorder %v4268_v63, 2  ;;  %v4280_v19 = vshrl.u32 %v1071_v33, 5 }
 0x11a   :  { %3884 = vsinq.f32 %v419_v9  ;;  %v290_v23 = vshll.u32 %v289_v62, 30  ;;  %v1085_v6 = vshll.u32 %v3973_v58, %v1073_v44  ;;  %v4283_v7 = vshll.u32 %v1067_v55, 8 }
 0x11b   :  { %v1246_v1 = vmul.f32 %v1245_v39, %v1243_v38  ;;  %vm427_vm14 = vcmp.eq.s32.totalorder %v4266_v57, 0  ;;  %vm2121_vm15 = vcmp.eq.s32.totalorder %v4268_v63, 0  ;;  %v1076_v12 = vshll.u32 %v3970_v50, %v1073_v44 }
 0x11c   :  { %v1079_v13 = vshll.u32 %v3971_v54, %v1073_v44  ;;  %v1083_v14 = vshrl.u32 %v3973_v58, %v1074_v59  ;;  %vm426_vm0 = vcmp.lt.s32.totalorder %v4266_v57, 2  ;;  %vm2120_vm1 = vcmp.lt.s32.totalorder %v4268_v63, 2 }
 0x11d   :  { %v1247_v11 = vxor.u32 2147483648, %v1246_v1  ;;  %v4293_v25 = vadd.s32 %v4244_v8, %v4249_v24  ;;  %v4295_v28 = vsub.s32 %v287_v42, %v290_v23  ;;  %v1082_v16 = vshll.u32 %v3972_v56, %v1073_v44 }
 0x11e   :  { %v1087_v0 = vor.u32 %v1086_v53, %v1085_v6  ;;  %vm423_vm3 = vweird.f32 %v4061_v17  ;;  %v1078_v33 = vor.u32 %v1077_v61, %v1076_v12  ;;  %v1081_v20 = vor.u32 %v1080_v5, %v1079_v13 }
 0x11f   :  { %v1248_v30 = vsel %vm1165_vm2, %v1247_v11, %v1246_v1  ;;  %v1089_v26 = vshrl.u32 %v3975_v3, %v1074_v59  ;;  %v293_v24 = vsub.s32 0, %v4295_v28  ;;  %v313_v34 = vsub.s32 4, %v289_v62 }
 0x120   :  { %v1251_v8 = vsel %vm4210_vm7, %v4063_v18, %v1248_v30  ;;  %vm1091_vm4 = vcmp.lt.s32.totalorder %v4280_v19, 1  ;;  %v1084_v40 = vor.u32 %v1083_v14, %v1082_v16  ;;  %v1088_v41 = vshll.u32 %v3974_v60, %v1073_v44 }
 0x121   :  { %3886 = vcosq.f32 %v1251_v8  ;;  %vm1094_vm5 = vcmp.lt.s32.totalorder %v4280_v19, 4  ;;  %v3637_v43 = vmin.u32 %v293_v24, %v4295_v28  ;;  %v1075_v51 = vshrl.u32 %v3970_v50, %v1074_v59 }
 0x122   :  { %3888 = vsinq.f32 %v1251_v8  ;;  %v1100_v36 = vsel %vm1094_vm5, %v1087_v0, 920167782  ;;  %v1090_v49 = vor.u32 %v1089_v26, %v1088_v41  ;;  %vm1092_vm2 = vcmp.lt.s32.totalorder %v4280_v19, 2 }
 0x123   :  { %v3883_v48 = vpop.eup %3882  ;;  %v1099_v42 = vsel %vm1091_vm4, %v1078_v33, %v1081_v20  ;;  %v295_v9 = vclz %v3637_v43  ;;  %v314_v10 = vsel %vm229_vm11, %v313_v34, %v289_v62  ;;  %vm1093_vm6 = vcmp.lt.s32.totalorder %v4280_v19, 3 }
 0x124   :  { %v3885_v27 = vpop.eup %3884  ;;  %v431_v37 = vxor.u32 2147483648, %v3883_v48  ;;  %vm2948_vm7 = vcmp.eq.s32.totalorder %v4272_v45, 2  ;;  %v1096_v46 = vsel %vm1094_vm5, %v1084_v40, 2102212464  ;;  %v1101_v38 = vsel %vm1093_vm6, %v1084_v40, %v1100_v36 }
 0x125   :  { %v428_v44 = vxor.u32 2147483648, %v3885_v27  ;;  %vm2945_vm8 = vcmp.eq.s32.totalorder %v4272_v45, 0  ;;  %vm4337_vm9 = vcmp.le.f32.partialorder %v227_v47, 0.7853982  ;;  %v3638_v61 = vadd.s32 4294967294, %v295_v9 }
 0x126   :  { %v432_v55 = vsel %vm430_vm12, %v431_v37, %v3885_v27  ;;  %v2126_v59 = vsel %vm2124_vm13, %v431_v37, %v3885_v27  ;;  %v1102_v5 = vsel %vm1092_vm2, %v1099_v42, %v1101_v38  ;;  %vm1258_vm10 = vcmp.lt.s32.totalorder %v4270_v2, 2 }
 0x127   :  { %v429_v39 = vsel %vm427_vm14, %v3883_v48, %v428_v44  ;;  %v2123_v62 = vsel %vm2121_vm15, %v3883_v48, %v428_v44  ;;  %vm2944_vm12 = vcmp.lt.s32.totalorder %v4272_v45, 2  ;;  %v1103_v47 = vsel %vm1091_vm4, %v1081_v20, %v1084_v40 }
 0x128   :  { %v433_v53 = vsel %vm426_vm0, %v429_v39, %v432_v55  ;;  %v2127_v23 = vsel %vm2120_vm1, %v2123_v62, %v2126_v59  ;;  %v1104_v6 = vsel %vm1094_vm5, %v1090_v49, 1326507024  ;;  %vm1255_vm13 = vweird.f32 %v4063_v18 }
 0x129   :  { %v434_v11 = vsel %vm423_vm3, nan, %v433_v53  ;;  %v2128_v57 = vsel %vm423_vm3, nan, %v2127_v23  ;;  %vm3639_vm14 = vcmp.lt.s32.totalorder %v3638_v61, 0  ;;  %v1105_v63 = vsel %vm1093_vm6, %v1087_v0, %v1104_v6 }
 0x12a   :  { %v1892_v12 = vmul.f32 7.071068, %v434_v11  ;;  %v3572_v13 = vmul.f32 7.071068, %v2128_v57  ;;  %v298_v14 = vsel %vm3639_vm14, 0, %v3638_v61  ;;  %v1106_v16 = vsel %vm1092_vm2, %v1103_v47, %v1105_v63 }
 0x12b   :  { %v299_v30 = vsub.s32 32, %v298_v14  ;;  %v303_v26 = vsub.s32 4294967266, %v298_v14  ;;  %v1095_v8 = vsel %vm1091_vm4, %v1075_v51, %v1078_v33  ;;  %v1097_v17 = vsel %vm1093_vm6, %v1081_v20, %v1096_v46  ;;  %v3887_v24 = vpop.eup %3886 }
 0x12c   :  { %1908 = vst [vmem:[#allocation2 + $0x10] sm:$0xff] %v1892_v12  ;;  %3588 = vst [vmem:[#allocation2 + $0x18] sm:$0xff] %v3572_v13  ;;  %v4367_v34 = vmul.u32.u64.low %v4283_v7, %v1106_v16  ;;  %v4368_v0 = vmul.u32.u64.high %v4283_v7, %v1106_v16, %v4367_v34  ;;  %v4371_v40 = vmul.u32.u64.low %v4283_v7, %v1102_v5  ;;  %v4372_v41 = vmul.u32.u64.high %v4283_v7, %v1102_v5, %v4371_v40  ;;  %v3889_v48 = vpop.eup %3888 }
 0x12d   :  { %v1263_v43 = vxor.u32 2147483648, %v3887_v24  ;;  %v300_v36 = vshll.u32 %v4295_v28, %v298_v14  ;;  %v301_v33 = vshrl.u32 %v4293_v25, %v299_v30  ;;  %v304_v51 = vadd.s32 127, %v303_v26 }
 0x12e   :  { %vm1259_vm15 = vcmp.eq.s32.totalorder %v4270_v2, 0  ;;  %v1260_v20 = vxor.u32 2147483648, %v3889_v48  ;;  %vm1262_vm0 = vcmp.eq.s32.totalorder %v4270_v2, 2  ;;  %v1098_v27 = vsel %vm1092_vm2, %v1095_v8, %v1097_v17 }
 0x12f   :  { %v1264_v37 = vsel %vm1262_vm0, %v1263_v43, %v3889_v48  ;;  %v2950_v49 = vsel %vm2948_vm7, %v1263_v43, %v3889_v48  ;;  %v302_v42 = vor.u32 %v301_v33, %v300_v36  ;;  %v305_v44 = vshll.u32 %v304_v51, 23 }
 0x130   :  { %v1261_v9 = vsel %vm1259_vm15, %v3887_v24, %v1260_v20  ;;  %v2947_v28 = vsel %vm2945_vm8, %v3887_v24, %v1260_v20  ;;  %v316_v25 = vsel %vm4337_vm9, 0, %v314_v10  ;;  %v542_v55 = vand.u32 2139095040, %v4078_v31 }
 0x131   :  { %v1265_v59 = vsel %vm1258_vm10, %v1261_v9, %v1264_v37  ;;  %v2951_v19 = vsel %vm2944_vm12, %v2947_v28, %v2950_v49  ;;  %v306_v46 = vor.u32 4788187, %v305_v44  ;;  %vm1116_vm1 = vc.u32 %v4368_v0, %v4371_v40 }
 0x132   :  { %v1266_v38 = vsel %vm1255_vm13, nan, %v1265_v59  ;;  %v2952_v39 = vsel %vm1255_vm13, nan, %v2951_v19  ;;  %v1114_v10 = vmul.u32 %v4283_v7, %v1098_v27  ;;  %v1117_v62 = vadd.s32 1, %v4372_v41 }
 0x133   :  { %v1900_v61 = vmul.f32 7.071068, %v1266_v38  ;;  %v3580_v2 = vmul.f32 7.071068, %v2952_v39  ;;  %v307_v5 = vand.u32 2147483647, %v306_v46  ;;  %v309_v53 = vcvt.s32.f32 %v302_v42 }
 0x134   :  { %v1118_v45 = vsel %vm1116_vm1, %v1117_v62, %v4372_v41  ;;  %v539_v23 = vand.u32 2147483647, %v4078_v31  ;;  %v543_v47 = vshrl.u32 %v542_v55, 23  ;;  %v320_v57 = vadd.s32 3, %v316_v25 }
 0x135   :  { %1916 = vst [vmem:[#allocation2 + $0x90] sm:$0xff] %v1900_v61  ;;  %3596 = vst [vmem:[#allocation2 + $0x98] sm:$0xff] %v3580_v2  ;;  %v310_v6 = vmul.f32 %v309_v53, %v307_v5  ;;  %v1119_v11 = vadd.s32 %v1118_v45, %v1114_v10  ;;  %v1374_v63 = vand.u32 2139095040, %v4080_v32  ;;  %v1371_v16 = vand.u32 2147483647, %v4080_v32 }
 0x136   :  { %v3648_v18 = vadd.s32 4294967169, %v543_v47  ;;  %v546_v13 = vand.u32 8388607, %v539_v23  ;;  %v4408_v26 = vand.u32 3, %v316_v25  ;;  %v4413_v24 = vand.u32 3, %v320_v57 }
 0x137   :  { %v311_v7 = vxor.u32 2147483648, %v310_v6  ;;  %v1120_v12 = vadd.s32 536870912, %v1119_v11  ;;  %v1375_v34 = vshrl.u32 %v1374_v63, 23  ;;  %v4417_v51 = vand.u32 8388607, %v1371_v16 }
 0x138   :  { %v549_v14 = vadd.s32 1, %v3648_v18  ;;  %v547_v36 = vor.u32 8388608, %v546_v13  ;;  %vm1061_vm4 = vcmp.lt.s32.totalorder %v4069_v22, 0  ;;  %v438_v49 = vand.u32 2139095040, %v4082_v35 }
 0x139   :  { %v312_v30 = vsel %vm229_vm11, %v311_v7, %v310_v6  ;;  %v1121_v8 = vshrl.u32 %v1120_v12, 30  ;;  %vm4421_vm11 = vcmp.le.f32.partialorder %v1059_v52, 0.7853982  ;;  %v3680_v37 = vadd.s32 4294967169, %v1375_v34 }
 0x13a   :  { %v315_v17 = vsel %vm4337_vm9, %v4067_v21, %v312_v30  ;;  %vm550_vm3 = vcmp.gt.s32.totalorder %v549_v14, 0  ;;  %vm326_vm5 = vcmp.eq.s32.totalorder %v4413_v24, 2  ;;  %vm2021_vm2 = vcmp.eq.s32.totalorder %v4408_v26, 2  ;;  %v4468_v30 = vpop.f32.mrb[5].mxu0 }
 0x13b   :  { %3890 = vcosq.f32 %v315_v17  ;;  %v1122_v41 = vshll.u32 %v1121_v8, 30  ;;  %v1145_v48 = vsub.s32 4, %v1121_v8  ;;  %v551_v43 = vsel %vm550_vm3, %v549_v14, 0 }
 0x13c   :  { %3892 = vsinq.f32 %v315_v17  ;;  %v553_v33 = vand.u32 31, %v551_v43  ;;  %v1115_v42 = vadd.s32 %v4371_v40, %v4368_v0  ;;  %v435_v9 = vand.u32 2147483647, %v4082_v35 }
 0x13d   :  { %v4425_v20 = vsub.s32 %v1119_v11, %v1122_v41  ;;  %v1146_v44 = vsel %vm1061_vm4, %v1145_v48, %v1121_v8  ;;  %vm323_vm6 = vcmp.eq.s32.totalorder %v4413_v24, 0  ;;  %vm2018_vm7 = vcmp.eq.s32.totalorder %v4408_v26, 0 }
 0x13e   :  { %v554_v27 = vsub.s32 32, %v553_v33  ;;  %v4441_v55 = vshll.u32 %v547_v36, 8  ;;  %v1379_v59 = vor.u32 8388608, %v4417_v51  ;;  %vm322_vm8 = vcmp.lt.s32.totalorder %v4413_v24, 2 }
 0x13f   :  { %v1125_v52 = vsub.s32 0, %v4425_v20  ;;  %vm2017_vm9 = vcmp.lt.s32.totalorder %v4408_v26, 2  ;;  %v4447_v40 = vshrl.u32 %v551_v43, 5  ;;  %v562_v46 = vshll.u32 %v3972_v56, %v553_v33 }
 0x140   :  { %v557_v28 = vshrl.u32 %v3971_v54, %v554_v27  ;;  %v563_v25 = vshrl.u32 %v3973_v58, %v554_v27  ;;  %v560_v19 = vshrl.u32 %v3972_v56, %v554_v27  ;;  %vm319_vm10 = vweird.f32 %v4067_v21 }
 0x141   :  { %v3669_v0 = vmin.u32 %v1125_v52, %v4425_v20  ;;  %v4454_v38 = vsel %vm4421_vm11, 0, %v1146_v44  ;;  %v556_v39 = vshll.u32 %v3970_v50, %v553_v33  ;;  %v1381_v10 = vadd.s32 1, %v3680_v37 }
 0x142   :  { %v4457_v62 = vshrl.u32 %v438_v49, 23  ;;  %v555_v2 = vshrl.u32 %v3970_v50, %v554_v27  ;;  %v559_v5 = vshll.u32 %v3971_v54, %v553_v33  ;;  %v564_v53 = vor.u32 %v563_v25, %v562_v46 }
 0x143   :  { %v1127_v61 = vclz %v3669_v0  ;;  %v558_v45 = vor.u32 %v557_v28, %v556_v39  ;;  %v565_v47 = vshll.u32 %v3973_v58, %v553_v33  ;;  %v566_v6 = vshrl.u32 %v3974_v60, %v554_v27 }
 0x144   :  { %v569_v11 = vshrl.u32 %v3975_v3, %v554_v27  ;;  %v561_v63 = vor.u32 %v560_v19, %v559_v5  ;;  %v568_v7 = vshll.u32 %v3974_v60, %v553_v33  ;;  %vm571_vm12 = vcmp.lt.s32.totalorder %v4447_v40, 1 }
 0x145   :  { %v3891_v57 = vpop.eup %3890  ;;  %v3670_v18 = vadd.s32 4294967294, %v1127_v61  ;;  %v567_v14 = vor.u32 %v566_v6, %v565_v47  ;;  %vm573_vm13 = vcmp.lt.s32.totalorder %v4447_v40, 3  ;;  %vm574_vm14 = vcmp.lt.s32.totalorder %v4447_v40, 4 }
 0x146   :  { %v3893_v12 = vpop.eup %3892  ;;  %v327_v13 = vxor.u32 2147483648, %v3891_v57  ;;  %v570_v17 = vor.u32 %v569_v11, %v568_v7  ;;  %v576_v34 = vsel %vm574_vm14, %v564_v53, 2102212464  ;;  %v575_v36 = vsel %vm571_vm12, %v555_v2, %v558_v45 }
 0x147   :  { %v324_v8 = vxor.u32 2147483648, %v3893_v12  ;;  %vm3671_vm15 = vcmp.lt.s32.totalorder %v3670_v18, 0  ;;  %v577_v49 = vsel %vm573_vm13, %v561_v63, %v576_v34  ;;  %v579_v39 = vsel %vm571_vm12, %v558_v45, %v561_v63 }
 0x148   :  { %v328_v41 = vsel %vm326_vm5, %v327_v13, %v3893_v12  ;;  %v2023_v48 = vsel %vm2021_vm2, %v327_v13, %v3893_v12  ;;  %v1130_v43 = vsel %vm3671_vm15, 0, %v3670_v18  ;;  %v583_v26 = vsel %vm571_vm12, %v561_v63, %v564_v53 }
 0x149   :  { %v325_v33 = vsel %vm323_vm6, %v3891_v57, %v324_v8  ;;  %v2020_v27 = vsel %vm2018_vm7, %v3891_v57, %v324_v8  ;;  %v1131_v37 = vsub.s32 32, %v1130_v43  ;;  %v1132_v28 = vshll.u32 %v4425_v20, %v1130_v43 }
 0x14a   :  { %v329_v52 = vsel %vm322_vm8, %v325_v33, %v328_v41  ;;  %v2024_v44 = vsel %vm2017_vm9, %v2020_v27, %v2023_v48  ;;  %v1135_v25 = vsub.s32 4294967266, %v1130_v43  ;;  %vm572_vm0 = vcmp.lt.s32.totalorder %v4447_v40, 2 }
 0x14b   :  { %v330_v0 = vsel %vm319_vm10, nan, %v329_v52  ;;  %v2025_v19 = vsel %vm319_vm10, nan, %v2024_v44  ;;  %v1133_v46 = vshrl.u32 %v1115_v42, %v1131_v37  ;;  %v580_v20 = vsel %vm574_vm14, %v567_v14, 920167782 }
 0x14c   :  { %v1891_v61 = vmul.f32 7.071068, %v330_v0  ;;  %v3571_v2 = vmul.f32 7.071068, %v2025_v19  ;;  %v1136_v24 = vadd.s32 127, %v1135_v25  ;;  %v581_v45 = vsel %vm573_vm13, %v564_v53, %v580_v20 }
 0x14d   :  { %v1134_v5 = vor.u32 %v1133_v46, %v1132_v28  ;;  %v584_v21 = vsel %vm574_vm14, %v570_v17, 1326507024  ;;  %vm1382_vm1 = vcmp.gt.s32.totalorder %v1381_v10, 0  ;;  %v578_v6 = vsel %vm572_vm0, %v575_v36, %v577_v49 }
 0x14e   :  { %1907 = vst [vmem:[#allocation2] sm:$0xff] %v1891_v61  ;;  %3587 = vst [vmem:[#allocation2 + $0x8] sm:$0xff] %v3571_v2  ;;  %v1137_v42 = vshll.u32 %v1136_v24, 23  ;;  %v585_v47 = vsel %vm573_vm13, %v567_v14, %v584_v21  ;;  %v582_v11 = vsel %vm572_vm0, %v579_v39, %v581_v45  ;;  %v1383_v18 = vsel %vm1382_vm1, %v1381_v10, 0 }
 0x14f   :  { %v586_v57 = vsel %vm572_vm0, %v583_v26, %v585_v47  ;;  %v4510_v13 = vshrl.u32 %v1383_v18, 5  ;;  %v4513_v8 = vmul.u32.u64.low %v4441_v55, %v582_v11  ;;  %v4514_v17 = vmul.u32.u64.high %v4441_v55, %v582_v11, %v4513_v8 }
 0x150   :  { %v1138_v63 = vor.u32 4788187, %v1137_v42  ;;  %v4507_v7 = vmul.u32.u64.low %v4441_v55, %v586_v57  ;;  %v4508_v12 = vmul.u32.u64.high %v4441_v55, %v586_v57, %v4507_v7  ;;  %v1385_v53 = vand.u32 31, %v1383_v18  ;;  %v4554_v18 = vpop.f32.mrb[5].mxu1 }
 0x151   :  { %v4519_v40 = vshll.u32 %v1379_v59, 8  ;;  %v1141_v34 = vcvt.s32.f32 %v1134_v5  ;;  %v1152_v10 = vadd.s32 3, %v4454_v38  ;;  %v594_v41 = vmul.u32 %v4441_v55, %v578_v6 }
 0x152   :  { %v1139_v14 = vand.u32 2147483647, %v1138_v63  ;;  %v1386_v48 = vsub.s32 32, %v1385_v53  ;;  %v1388_v43 = vshll.u32 %v3970_v50, %v1385_v53  ;;  %vm1403_vm3 = vcmp.lt.s32.totalorder %v4510_v13, 1 }
 0x153   :  { %v3644_v36 = vadd.s32 4294967169, %v4457_v62  ;;  %vm596_vm5 = vc.u32 %v4508_v12, %v4513_v8  ;;  %v1391_v51 = vshll.u32 %v3971_v54, %v1385_v53  ;;  %v1394_v59 = vshll.u32 %v3972_v56, %v1385_v53 }
 0x154   :  { %v1142_v33 = vmul.f32 %v1141_v34, %v1139_v14  ;;  %v597_v27 = vadd.s32 1, %v4514_v17  ;;  %v1389_v37 = vshrl.u32 %v3971_v54, %v1386_v48  ;;  %v1392_v55 = vshrl.u32 %v3972_v56, %v1386_v48 }
 0x155   :  { %v1397_v49 = vshll.u32 %v3973_v58, %v1385_v53  ;;  %v1395_v44 = vshrl.u32 %v3973_v58, %v1386_v48  ;;  %v1398_v62 = vshrl.u32 %v3974_v60, %v1386_v48  ;;  %v1400_v28 = vshll.u32 %v3974_v60, %v1385_v53 }
 0x156   :  { %v1143_v52 = vxor.u32 2147483648, %v1142_v33  ;;  %v598_v25 = vsel %vm596_vm5, %v597_v27, %v4514_v17  ;;  %v1390_v0 = vor.u32 %v1389_v37, %v1388_v43  ;;  %v1393_v19 = vor.u32 %v1392_v55, %v1391_v51 }
 0x157   :  { %v1401_v46 = vshrl.u32 %v3975_v3, %v1386_v48  ;;  %v599_v61 = vadd.s32 %v598_v25, %v594_v41  ;;  %v1396_v2 = vor.u32 %v1395_v44, %v1394_v59  ;;  %v1399_v24 = vor.u32 %v1398_v62, %v1397_v49 }
 0x158   :  { %v1144_v39 = vsel %vm1061_vm4, %v1143_v52, %v1142_v33  ;;  %v1387_v5 = vshrl.u32 %v3970_v50, %v1386_v48  ;;  %vm1405_vm2 = vcmp.lt.s32.totalorder %v4510_v13, 3  ;;  %vm1406_vm6 = vcmp.lt.s32.totalorder %v4510_v13, 4 }
 0x159   :  { %v1147_v26 = vsel %vm4421_vm11, %v4069_v22, %v1144_v39  ;;  %v1402_v20 = vor.u32 %v1401_v46, %v1400_v28  ;;  %v600_v21 = vadd.s32 536870912, %v599_v61  ;;  %v1411_v42 = vsel %vm1403_vm3, %v1390_v0, %v1393_v19 }
 0x15a   :  { %3894 = vcosq.f32 %v1147_v26  ;;  %v1408_v45 = vsel %vm1406_vm6, %v1396_v2, 2102212464  ;;  %v1412_v47 = vsel %vm1406_vm6, %v1399_v24, 920167782  ;;  %v1415_v6 = vsel %vm1403_vm3, %v1393_v19, %v1396_v2 }
 0x15b   :  { %3896 = vsinq.f32 %v1147_v26  ;;  %v601_v1 = vshrl.u32 %v600_v21, 30  ;;  %vm1404_vm11 = vcmp.lt.s32.totalorder %v4510_v13, 2  ;;  %v1413_v11 = vsel %vm1405_vm2, %v1396_v2, %v1412_v47 }
 0x15c   :  { %v1416_v57 = vsel %vm1406_vm6, %v1402_v20, 1326507024  ;;  %v2840_v63 = vand.u32 3, %v4454_v38  ;;  %v1407_v7 = vsel %vm1403_vm3, %v1387_v5, %v1390_v0  ;;  %v1414_v17 = vsel %vm1404_vm11, %v1411_v42, %v1413_v11 }
 0x15d   :  { %v1417_v53 = vsel %vm1405_vm2, %v1399_v24, %v1416_v57  ;;  %v602_v14 = vshll.u32 %v601_v1, 30  ;;  %v1409_v34 = vsel %vm1405_vm2, %v1393_v19, %v1408_v45  ;;  %v445_v48 = vadd.s32 1, %v3644_v36 }
 0x15e   :  { %v1418_v41 = vsel %vm1404_vm11, %v1415_v6, %v1417_v53  ;;  %v4572_v33 = vmul.u32.u64.low %v4519_v40, %v1414_v17  ;;  %v4573_v51 = vmul.u32.u64.high %v4519_v40, %v1414_v17, %v4572_v33  ;;  %v1153_v59 = vand.u32 3, %v1152_v10 }
 0x15f   :  { %v4568_v43 = vmul.u32.u64.low %v4519_v40, %v1418_v41  ;;  %v4569_v38 = vmul.u32.u64.high %v4519_v40, %v1418_v41, %v4568_v43  ;;  %v4576_v27 = vsub.s32 %v599_v61, %v602_v14  ;;  %vm446_vm4 = vcmp.gt.s32.totalorder %v445_v48, 0 }
 0x160   :  { %vm1151_vm7 = vweird.f32 %v4069_v22  ;;  %vm4581_vm8 = vcmp.le.f32.partialorder %v539_v23, 0.7853982  ;;  %vm541_vm9 = vcmp.lt.s32.totalorder %v4078_v31, 0  ;;  %v625_v55 = vsub.s32 4, %v601_v1 }
 0x161   :  { %v605_v36 = vsub.s32 0, %v4576_v27  ;;  %v1410_v49 = vsel %vm1404_vm11, %v1407_v7, %v1409_v34  ;;  %v442_v10 = vand.u32 8388607, %v435_v9  ;;  %vm2841_vm10 = vcmp.lt.s32.totalorder %v2840_v63, 2 }
 0x162   :  { %vm1428_vm12 = vc.u32 %v4569_v38, %v4572_v33  ;;  %v1429_v23 = vadd.s32 1, %v4573_v51  ;;  %v447_v52 = vsel %vm446_vm4, %v445_v48, 0  ;;  %vm1154_vm13 = vcmp.lt.s32.totalorder %v1153_v59, 2 }
 0x163   :  { %vm2842_vm14 = vcmp.eq.s32.totalorder %v2840_v63, 0  ;;  %vm2845_vm15 = vcmp.eq.s32.totalorder %v2840_v63, 2  ;;  %v3649_v62 = vmin.u32 %v605_v36, %v4576_v27  ;;  %vm1158_vm0 = vcmp.eq.s32.totalorder %v1153_v59, 2 }
 0x164   :  { %v3895_v44 = vpop.eup %3894  ;;  %v1426_v25 = vmul.u32 %v4519_v40, %v1410_v49  ;;  %v1430_v0 = vsel %vm1428_vm12, %v1429_v23, %v4573_v51  ;;  %v626_v39 = vsel %vm541_vm9, %v625_v55, %v601_v1  ;;  %v449_v61 = vand.u32 31, %v447_v52 }
 0x165   :  { %v3897_v28 = vpop.eup %3896  ;;  %v1159_v13 = vxor.u32 2147483648, %v3895_v44  ;;  %v607_v46 = vclz %v3649_v62  ;;  %vm1155_vm1 = vcmp.eq.s32.totalorder %v1153_v59, 0  ;;  %v443_v42 = vor.u32 8388608, %v442_v10 }
 0x166   :  { %v1156_v19 = vxor.u32 2147483648, %v3897_v28  ;;  %v1431_v26 = vadd.s32 %v1430_v0, %v1426_v25  ;;  %v4604_v47 = vsel %vm4581_vm8, 0, %v626_v39  ;;  %v450_v57 = vsub.s32 32, %v449_v61 }
 0x167   :  { %v1160_v2 = vsel %vm1158_vm0, %v1159_v13, %v3897_v28  ;;  %v2847_v24 = vsel %vm2845_vm15, %v1159_v13, %v3897_v28  ;;  %v3650_v21 = vadd.s32 4294967294, %v607_v46  ;;  %v595_v63 = vadd.s32 %v4513_v8, %v4508_v12 }
 0x168   :  { %v1157_v5 = vsel %vm1155_vm1, %v3895_v44, %v1156_v19  ;;  %v2844_v20 = vsel %vm2842_vm14, %v3895_v44, %v1156_v19  ;;  %v1432_v6 = vadd.s32 536870912, %v1431_v26  ;;  %vm1373_vm5 = vcmp.lt.s32.totalorder %v4080_v32, 0 }
 0x169   :  { %v1161_v45 = vsel %vm1154_vm13, %v1157_v5, %v1160_v2  ;;  %v2848_v40 = vsel %vm2841_vm10, %v2844_v20, %v2847_v24  ;;  %vm3651_vm3 = vcmp.lt.s32.totalorder %v3650_v21, 0  ;;  %v4613_v43 = vshll.u32 %v443_v42, 8  ;;  %v4636_v20 = vpop.f32.mrb[6].mxu0 }
 0x16a   :  { %v1162_v1 = vsel %vm1151_vm7, nan, %v1161_v45  ;;  %v2849_v11 = vsel %vm1151_vm7, nan, %v2848_v40  ;;  %v610_v53 = vsel %vm3651_vm3, 0, %v3650_v21  ;;  %v1433_v14 = vshrl.u32 %v1432_v6, 30 }
 0x16b   :  { %v1899_v7 = vmul.f32 7.071068, %v1162_v1  ;;  %v3579_v17 = vmul.f32 7.071068, %v2849_v11  ;;  %v611_v34 = vsub.s32 32, %v610_v53  ;;  %v615_v41 = vsub.s32 4294967266, %v610_v53 }
 0x16c   :  { %v1434_v48 = vshll.u32 %v1433_v14, 30  ;;  %v1267_v22 = vand.u32 2147483647, %v4107_v15  ;;  %v612_v51 = vshll.u32 %v4576_v27, %v610_v53  ;;  %v4618_v55 = vadd.s32 3, %v4604_v47 }
 0x16d   :  { %1915 = vst [vmem:[#allocation2 + $0x80] sm:$0xff] %v1899_v7  ;;  %3595 = vst [vmem:[#allocation2 + $0x88] sm:$0xff] %v3579_v17  ;;  %v613_v59 = vshrl.u32 %v595_v63, %v611_v34  ;;  %v616_v36 = vadd.s32 127, %v615_v41  ;;  %v4622_v12 = vshrl.u32 %v447_v52, 5  ;;  %v453_v8 = vshrl.u32 %v3971_v54, %v450_v57 }
 0x16e   :  { %v4620_v49 = vsub.s32 %v1431_v26, %v1434_v48  ;;  %v456_v10 = vshrl.u32 %v3972_v56, %v450_v57  ;;  %v452_v62 = vshll.u32 %v3970_v50, %v449_v61  ;;  %v459_v28 = vshrl.u32 %v3973_v58, %v450_v57 }
 0x16f   :  { %v614_v23 = vor.u32 %v613_v59, %v612_v51  ;;  %v617_v44 = vshll.u32 %v616_v36, 23  ;;  %v1457_v13 = vsub.s32 4, %v1433_v14  ;;  %v455_v25 = vshll.u32 %v3971_v54, %v449_v61 }
 0x170   :  { %v1437_v27 = vsub.s32 0, %v4620_v49  ;;  %v462_v0 = vshrl.u32 %v3974_v60, %v450_v57  ;;  %v458_v52 = vshll.u32 %v3972_v56, %v449_v61  ;;  %v461_v46 = vshll.u32 %v3973_v58, %v449_v61 }
 0x171   :  { %v618_v19 = vor.u32 4788187, %v617_v44  ;;  %v465_v39 = vshrl.u32 %v3975_v3, %v450_v57  ;;  %v454_v24 = vor.u32 %v453_v8, %v452_v62  ;;  %v457_v26 = vor.u32 %v456_v10, %v455_v25 }
 0x172   :  { %v3681_v2 = vmin.u32 %v1437_v27, %v4620_v49  ;;  %v464_v5 = vshll.u32 %v3974_v60, %v449_v61  ;;  %v621_v42 = vcvt.s32.f32 %v614_v23  ;;  %v460_v45 = vor.u32 %v459_v28, %v458_v52 }
 0x173   :  { %v619_v21 = vand.u32 2147483647, %v618_v19  ;;  %v463_v40 = vor.u32 %v462_v0, %v461_v46  ;;  %vm4640_vm2 = vcmp.le.f32.partialorder %v1371_v16, 0.7853982  ;;  %v1427_v1 = vadd.s32 %v4572_v33, %v4569_v38 }
 0x174   :  { %v1439_v11 = vclz %v3681_v2  ;;  %v451_v7 = vshrl.u32 %v3970_v50, %v450_v57  ;;  %v466_v17 = vor.u32 %v465_v39, %v464_v5  ;;  %v1458_v53 = vsel %vm1373_vm5, %v1457_v13, %v1433_v14 }
 0x175   :  { %v622_v61 = vmul.f32 %v621_v42, %v619_v21  ;;  %vm467_vm6 = vcmp.lt.s32.totalorder %v4622_v12, 1  ;;  %vm468_vm11 = vcmp.lt.s32.totalorder %v4622_v12, 2  ;;  %vm469_vm4 = vcmp.lt.s32.totalorder %v4622_v12, 3 }
 0x176   :  { %v3682_v63 = vadd.s32 4294967294, %v1439_v11  ;;  %vm470_vm7 = vcmp.lt.s32.totalorder %v4622_v12, 4  ;;  %v475_v16 = vsel %vm467_vm6, %v454_v24, %v457_v26  ;;  %v471_v38 = vsel %vm467_vm6, %v451_v7, %v454_v24 }
 0x177   :  { %v623_v34 = vxor.u32 2147483648, %v622_v61  ;;  %v472_v33 = vsel %vm470_vm7, %v460_v45, 2102212464  ;;  %v476_v41 = vsel %vm470_vm7, %v463_v40, 920167782  ;;  %v479_v48 = vsel %vm467_vm6, %v457_v26, %v460_v45 }
 0x178   :  { %vm3683_vm10 = vcmp.lt.s32.totalorder %v3682_v63, 0  ;;  %v477_v57 = vsel %vm469_vm4, %v460_v45, %v476_v41  ;;  %v480_v14 = vsel %vm470_vm7, %v466_v17, 1326507024  ;;  %v473_v36 = vsel %vm469_vm4, %v457_v26, %v472_v33 }
 0x179   :  { %v624_v51 = vsel %vm541_vm9, %v623_v34, %v622_v61  ;;  %v1442_v59 = vsel %vm3683_vm10, 0, %v3682_v63  ;;  %v478_v8 = vsel %vm468_vm11, %v475_v16, %v477_v57  ;;  %v481_v28 = vsel %vm469_vm4, %v463_v40, %v480_v14 }
 0x17a   :  { %v627_v10 = vsel %vm4581_vm8, %v4078_v31, %v624_v51  ;;  %v1443_v23 = vsub.s32 32, %v1442_v59  ;;  %v1444_v44 = vshll.u32 %v4620_v49, %v1442_v59  ;;  %v1447_v62 = vsub.s32 4294967266, %v1442_v59 }
 0x17b   :  { %3898 = vcosq.f32 %v627_v10  ;;  %v4668_v27 = vmul.u32.u64.low %v4613_v43, %v478_v8  ;;  %v4669_v13 = vmul.u32.u64.high %v4613_v43, %v478_v8, %v4668_v27  ;;  %v482_v37 = vsel %vm468_vm11, %v479_v48, %v481_v28 }
 0x17c   :  { %3900 = vsinq.f32 %v627_v10  ;;  %v1445_v25 = vshrl.u32 %v1427_v1, %v1443_v23  ;;  %v1448_v0 = vadd.s32 127, %v1447_v62  ;;  %v2325_v19 = vand.u32 3, %v4604_v47  ;;  %v4709_v62 = vpop.f32.mrb[6].mxu1 }
 0x17d   :  { %v1460_v49 = vsel %vm4640_vm2, 0, %v1458_v53  ;;  %v4678_v52 = vmul.u32.u64.low %v4613_v43, %v482_v37  ;;  %v4679_v46 = vmul.u32.u64.high %v4613_v43, %v482_v37, %v4678_v52  ;;  %v474_v24 = vsel %vm468_vm11, %v471_v38, %v473_v36 }
 0x17e   :  { %v1446_v39 = vor.u32 %v1445_v25, %v1444_v44  ;;  %v1449_v2 = vshll.u32 %v1448_v0, 23  ;;  %v1270_v26 = vand.u32 2139095040, %v4107_v15  ;;  %v493_v5 = vadd.s32 1, %v4669_v13 }
 0x17f   :  { %v633_v21 = vand.u32 3, %v4618_v55  ;;  %vm2326_vm8 = vcmp.lt.s32.totalorder %v2325_v19, 2  ;;  %v1464_v45 = vadd.s32 3, %v1460_v49  ;;  %v490_v40 = vmul.u32 %v4613_v43, %v474_v24 }
 0x180   :  { %v1450_v42 = vor.u32 4788187, %v1449_v2  ;;  %v1271_v47 = vshrl.u32 %v1270_v26, 23  ;;  %vm492_vm9 = vc.u32 %v4679_v46, %v4668_v27  ;;  %v4691_v1 = vand.u32 8388607, %v1267_v22 }
 0x181   :  { %vm631_vm12 = vweird.f32 %v4078_v31  ;;  %v1453_v11 = vcvt.s32.f32 %v1446_v39  ;;  %v494_v7 = vsel %vm492_vm9, %v493_v5, %v4669_v13  ;;  %vm2327_vm13 = vcmp.eq.s32.totalorder %v2325_v19, 0 }
 0x182   :  { %v1451_v12 = vand.u32 2147483647, %v1450_v42  ;;  %v3676_v55 = vadd.s32 4294967169, %v1271_v47  ;;  %vm2330_vm14 = vcmp.eq.s32.totalorder %v2325_v19, 2  ;;  %v495_v17 = vadd.s32 %v494_v7, %v490_v40 }
 0x183   :  { %v747_v61 = vand.u32 2147483647, %v4237_v4  ;;  %vm634_vm15 = vcmp.lt.s32.totalorder %v633_v21, 2  ;;  %vm635_vm0 = vcmp.eq.s32.totalorder %v633_v21, 0  ;;  %vm638_vm1 = vcmp.eq.s32.totalorder %v633_v21, 2 }
 0x184   :  { %v1454_v43 = vmul.f32 %v1453_v11, %v1451_v12  ;;  %v1277_v53 = vadd.s32 1, %v3676_v55  ;;  %v4696_v16 = vand.u32 3, %v1464_v45  ;;  %v4698_v34 = vand.u32 3, %v1460_v49 }
 0x185   :  { %v3899_v63 = vpop.eup %3898  ;;  %v496_v38 = vadd.s32 536870912, %v495_v17  ;;  %v1275_v48 = vor.u32 8388608, %v4691_v1  ;;  %v750_v59 = vand.u32 2139095040, %v4237_v4  ;;  %v4704_v36 = vand.u32 8388607, %v747_v61 }
 0x186   :  { %v3901_v33 = vpop.eup %3900  ;;  %v639_v41 = vxor.u32 2147483648, %v3899_v63  ;;  %v1455_v57 = vxor.u32 2147483648, %v1454_v43  ;;  %vm1278_vm3 = vcmp.gt.s32.totalorder %v1277_v53, 0  ;;  %vm3154_vm6 = vcmp.eq.s32.totalorder %v4698_v34, 2 }
 0x187   :  { %v636_v14 = vxor.u32 2147483648, %v3901_v33  ;;  %v497_v51 = vshrl.u32 %v496_v38, 30  ;;  %v1279_v44 = vsel %vm1278_vm3, %v1277_v53, 0  ;;  %v751_v42 = vshrl.u32 %v750_v59, 23 }
 0x188   :  { %v640_v8 = vsel %vm638_vm1, %v639_v41, %v3901_v33  ;;  %v2332_v10 = vsel %vm2330_vm14, %v639_v41, %v3901_v33  ;;  %v1456_v23 = vsel %vm1373_vm5, %v1455_v57, %v1454_v43  ;;  %v1281_v6 = vand.u32 31, %v1279_v44 }
 0x189   :  { %v637_v28 = vsel %vm635_vm0, %v3899_v63, %v636_v14  ;;  %v2329_v13 = vsel %vm2327_vm13, %v3899_v63, %v636_v14  ;;  %v1459_v25 = vsel %vm4640_vm2, %v4080_v32, %v1456_v23  ;;  %v498_v0 = vshll.u32 %v497_v51, 30 }
 0x18a   :  { %v641_v37 = vsel %vm634_vm15, %v637_v28, %v640_v8  ;;  %v2333_v49 = vsel %vm2326_vm8, %v2329_v13, %v2332_v10  ;;  %3902 = vcosq.f32 %v1459_v25  ;;  %v521_v52 = vsub.s32 4, %v497_v51 }
 0x18b   :  { %v642_v39 = vsel %vm631_vm12, nan, %v641_v37  ;;  %v2334_v2 = vsel %vm631_vm12, nan, %v2333_v49  ;;  %3904 = vsinq.f32 %v1459_v25  ;;  %v4722_v24 = vsub.s32 %v495_v17, %v498_v0 }
 0x18c   :  { %v1894_v26 = vmul.f32 7.071068, %v642_v39  ;;  %v3574_v5 = vmul.f32 7.071068, %v2334_v2  ;;  %vm4726_vm5 = vcmp.le.f32.partialorder %v435_v9, 0.7853982  ;;  %v491_v9 = vadd.s32 %v4668_v27, %v4679_v46 }
 0x18d   :  { %vm437_vm2 = vcmp.lt.s32.totalorder %v4082_v35, 0  ;;  %v501_v21 = vsub.s32 0, %v4722_v24  ;;  %v4735_v47 = vshrl.u32 %v1279_v44, 5  ;;  %v1282_v45 = vsub.s32 32, %v1281_v6 }
 0x18e   :  { %1910 = vst [vmem:[#allocation2 + $0x30] sm:$0xff] %v1894_v26  ;;  %3590 = vst [vmem:[#allocation2 + $0x38] sm:$0xff] %v3574_v5  ;;  %v522_v31 = vsel %vm437_vm2, %v521_v52, %v497_v51  ;;  %vm1467_vm11 = vcmp.eq.s32.totalorder %v4696_v16, 0  ;;  %vm1470_vm4 = vcmp.eq.s32.totalorder %v4696_v16, 2  ;;  %vm3151_vm7 = vcmp.eq.s32.totalorder %v4698_v34, 0 }
 0x18f   :  { %v3645_v40 = vmin.u32 %v501_v21, %v4722_v24  ;;  %vm1466_vm10 = vcmp.lt.s32.totalorder %v4696_v16, 2  ;;  %vm3150_vm8 = vcmp.lt.s32.totalorder %v4698_v34, 2  ;;  %v4745_v1 = vshll.u32 %v1275_v48, 8 }
 0x190   :  { %v4747_v12 = vadd.s32 4294967169, %v751_v42  ;;  %v755_v11 = vor.u32 8388608, %v4704_v36  ;;  %v1582_v7 = vand.u32 2139095040, %v4298_v29  ;;  %vm1463_vm9 = vweird.f32 %v4080_v32 }
 0x191   :  { %v503_v55 = vclz %v3645_v40  ;;  %v4754_v27 = vsel %vm4726_vm5, 0, %v522_v31  ;;  %v1285_v46 = vshrl.u32 %v3971_v54, %v1282_v45  ;;  %v1288_v17 = vshrl.u32 %v3972_v56, %v1282_v45 }
 0x192   :  { %v1284_v43 = vshll.u32 %v3970_v50, %v1281_v6  ;;  %v1287_v53 = vshll.u32 %v3971_v54, %v1281_v6  ;;  %v1291_v63 = vshrl.u32 %v3973_v58, %v1282_v45  ;;  %vm1299_vm12 = vcmp.lt.s32.totalorder %v4735_v47, 1 }
 0x193   :  { %v3646_v38 = vadd.s32 4294967294, %v503_v55  ;;  %v1290_v33 = vshll.u32 %v3972_v56, %v1281_v6  ;;  %v1293_v41 = vshll.u32 %v3973_v58, %v1281_v6  ;;  %v1294_v57 = vshrl.u32 %v3974_v60, %v1282_v45 }
 0x194   :  { %v3903_v48 = vpop.eup %3902  ;;  %v1283_v14 = vshrl.u32 %v3970_v50, %v1282_v45  ;;  %v1286_v51 = vor.u32 %v1285_v46, %v1284_v43  ;;  %v1289_v59 = vor.u32 %v1288_v17, %v1287_v53  ;;  %v1297_v8 = vshrl.u32 %v3975_v3, %v1282_v45 }
 0x195   :  { %v3905_v10 = vpop.eup %3904  ;;  %v1471_v23 = vxor.u32 2147483648, %v3903_v48  ;;  %vm3647_vm13 = vcmp.lt.s32.totalorder %v3646_v38, 0  ;;  %v1292_v44 = vor.u32 %v1291_v63, %v1290_v33  ;;  %v1296_v28 = vshll.u32 %v3974_v60, %v1281_v6 }
 0x196   :  { %vm1300_vm14 = vcmp.lt.s32.totalorder %v4735_v47, 2  ;;  %v1468_v13 = vxor.u32 2147483648, %v3905_v10  ;;  %v506_v25 = vsel %vm3647_vm13, 0, %v3646_v38  ;;  %v1295_v0 = vor.u32 %v1294_v57, %v1293_v41 }
 0x197   :  { %vm1301_vm15 = vcmp.lt.s32.totalorder %v4735_v47, 3  ;;  %v1472_v37 = vsel %vm1470_vm4, %v1471_v23, %v3905_v10  ;;  %v3156_v49 = vsel %vm3154_vm6, %v1471_v23, %v3905_v10  ;;  %v507_v52 = vsub.s32 32, %v506_v25 }
 0x198   :  { %vm1302_vm0 = vcmp.lt.s32.totalorder %v4735_v47, 4  ;;  %v1469_v39 = vsel %vm1467_vm11, %v3903_v48, %v1468_v13  ;;  %v3153_v2 = vsel %vm3151_vm7, %v3903_v48, %v1468_v13  ;;  %v511_v26 = vsub.s32 4294967266, %v506_v25 }
 0x199   :  { %v1298_v5 = vor.u32 %v1297_v8, %v1296_v28  ;;  %v1473_v6 = vsel %vm1466_vm10, %v1469_v39, %v1472_v37  ;;  %v3157_v42 = vsel %vm3150_vm8, %v3153_v2, %v3156_v49  ;;  %v508_v21 = vshll.u32 %v4722_v24, %v506_v25 }
 0x19a   :  { %v509_v31 = vshrl.u32 %v491_v9, %v507_v52  ;;  %v1474_v45 = vsel %vm1463_vm9, nan, %v1473_v6  ;;  %v3158_v40 = vsel %vm1463_vm9, nan, %v3157_v42  ;;  %v512_v55 = vadd.s32 127, %v511_v26 }
 0x19b   :  { %v1304_v46 = vsel %vm1302_vm0, %v1292_v44, 2102212464  ;;  %v1902_v17 = vmul.f32 7.071068, %v1474_v45  ;;  %v3582_v43 = vmul.f32 7.071068, %v3158_v40  ;;  %v1307_v34 = vsel %vm1299_vm12, %v1286_v51, %v1289_v59 }
 0x19c   :  { %v510_v16 = vor.u32 %v509_v31, %v508_v21  ;;  %v513_v53 = vshll.u32 %v512_v55, 23  ;;  %v1308_v24 = vsel %vm1302_vm0, %v1295_v0, 920167782  ;;  %v1311_v9 = vsel %vm1299_vm12, %v1289_v59, %v1292_v44 }
 0x19d   :  { %v1312_v32 = vsel %vm1302_vm0, %v1298_v5, 1326507024  ;;  %1918 = vst [vmem:[#allocation2 + $0xb0] sm:$0xff] %v1902_v17  ;;  %3598 = vst [vmem:[#allocation2 + $0xb8] sm:$0xff] %v3582_v43  ;;  %v1303_v63 = vsel %vm1299_vm12, %v1283_v14, %v1286_v51  ;;  %v1305_v38 = vsel %vm1301_vm15, %v1289_v59, %v1304_v46  ;;  %v1309_v33 = vsel %vm1301_vm15, %v1292_v44, %v1308_v24 }
 0x19e   :  { %v1313_v41 = vsel %vm1301_vm15, %v1295_v0, %v1312_v32  ;;  %v514_v57 = vor.u32 4788187, %v513_v53  ;;  %v1310_v48 = vsel %vm1300_vm14, %v1307_v34, %v1309_v33  ;;  %v757_v10 = vadd.s32 1, %v4747_v12 }
 0x19f   :  { %v1314_v8 = vsel %vm1300_vm14, %v1311_v9, %v1313_v41  ;;  %v4816_v59 = vmul.u32.u64.low %v4745_v1, %v1310_v48  ;;  %v4817_v23 = vmul.u32.u64.high %v4745_v1, %v1310_v48, %v4816_v59  ;;  %v517_v28 = vcvt.s32.f32 %v510_v16 }
 0x1a0   :  { %v4812_v14 = vmul.u32.u64.low %v4745_v1, %v1314_v8  ;;  %v4813_v51 = vmul.u32.u64.high %v4745_v1, %v1314_v8, %v4812_v14  ;;  %v515_v44 = vand.u32 2147483647, %v514_v57  ;;  %v1306_v13 = vsel %vm1300_vm14, %v1303_v63, %v1305_v38  ;;  %v4857_v57 = vpop.f32.mrb[7].mxu0 }
 0x1a1   :  { %vm758_vm1 = vcmp.gt.s32.totalorder %v757_v10, 0  ;;  %v528_v37 = vadd.s32 3, %v4754_v27  ;;  %v4825_v49 = vshll.u32 %v755_v11, 8  ;;  %v1322_v52 = vmul.u32 %v4745_v1, %v1306_v13 }
 0x1a2   :  { %v759_v25 = vsel %vm758_vm1, %v757_v10, 0  ;;  %v518_v0 = vmul.f32 %v517_v28, %v515_v44  ;;  %vm1324_vm3 = vc.u32 %v4813_v51, %v4816_v59  ;;  %v1325_v39 = vadd.s32 1, %v4817_v23 }
 0x1a3   :  { %v761_v12 = vand.u32 31, %v759_v25  ;;  %v1583_v47 = vshrl.u32 %v1582_v7, 23  ;;  %v4833_v26 = vshrl.u32 %v759_v25, 5  ;;  %v2222_v32 = vand.u32 3, %v4754_v27 }
 0x1a4   :  { %v519_v2 = vxor.u32 2147483648, %v518_v0  ;;  %v1326_v36 = vsel %vm1324_vm3, %v1325_v39, %v4817_v23  ;;  %vm1269_vm6 = vcmp.lt.s32.totalorder %v4107_v15, 0  ;;  %v529_v44 = vand.u32 3, %v528_v37 }
 0x1a5   :  { %v762_v5 = vsub.s32 32, %v761_v12  ;;  %v764_v6 = vshll.u32 %v3970_v50, %v761_v12  ;;  %v767_v11 = vshll.u32 %v3971_v54, %v761_v12  ;;  %v770_v1 = vshll.u32 %v3972_v56, %v761_v12 }
 0x1a6   :  { %v773_v42 = vshll.u32 %v3973_v58, %v761_v12  ;;  %v520_v21 = vsel %vm437_vm2, %v519_v2, %v518_v0  ;;  %v1327_v31 = vadd.s32 %v1326_v36, %v1322_v52  ;;  %v776_v45 = vshll.u32 %v3974_v60, %v761_v12 }
 0x1a7   :  { %v765_v7 = vshrl.u32 %v3971_v54, %v762_v5  ;;  %v523_v40 = vsel %vm4726_vm5, %v4082_v35, %v520_v21  ;;  %v768_v55 = vshrl.u32 %v3972_v56, %v762_v5  ;;  %v771_v46 = vshrl.u32 %v3973_v58, %v762_v5 }
 0x1a8   :  { %v774_v17 = vshrl.u32 %v3974_v60, %v762_v5  ;;  %3906 = vcosq.f32 %v523_v40  ;;  %v1328_v43 = vadd.s32 536870912, %v1327_v31  ;;  %v777_v34 = vshrl.u32 %v3975_v3, %v762_v5 }
 0x1a9   :  { %v766_v16 = vor.u32 %v765_v7, %v764_v6  ;;  %3908 = vsinq.f32 %v523_v40  ;;  %v769_v53 = vor.u32 %v768_v55, %v767_v11  ;;  %v772_v24 = vor.u32 %v771_v46, %v770_v1 }
 0x1aa   :  { %v775_v9 = vor.u32 %v774_v17, %v773_v42  ;;  %v1329_v63 = vshrl.u32 %v1328_v43, 30  ;;  %v778_v19 = vor.u32 %v777_v34, %v776_v45  ;;  %vm779_vm5 = vcmp.lt.s32.totalorder %v4833_v26, 1 }
 0x1ab   :  { %v763_v38 = vshrl.u32 %v3970_v50, %v762_v5  ;;  %vm782_vm2 = vcmp.lt.s32.totalorder %v4833_v26, 4  ;;  %v787_v33 = vsel %vm779_vm5, %v766_v16, %v769_v53  ;;  %v3688_v41 = vadd.s32 4294967169, %v1583_v47 }
 0x1ac   :  { %v1330_v48 = vshll.u32 %v1329_v63, 30  ;;  %vm781_vm11 = vcmp.lt.s32.totalorder %v4833_v26, 3  ;;  %v784_v27 = vsel %vm782_vm2, %v772_v24, 2102212464  ;;  %v788_v8 = vsel %vm782_vm2, %v775_v9, 920167782 }
 0x1ad   :  { %vm780_vm4 = vcmp.lt.s32.totalorder %v4833_v26, 2  ;;  %v789_v10 = vsel %vm781_vm11, %v772_v24, %v788_v8  ;;  %v791_v14 = vsel %vm779_vm5, %v769_v53, %v772_v24  ;;  %v792_v23 = vsel %vm782_vm2, %v778_v19, 1326507024 }
 0x1ae   :  { %v4864_v28 = vsub.s32 %v1327_v31, %v1330_v48  ;;  %v783_v13 = vsel %vm779_vm5, %v763_v38, %v766_v16  ;;  %v790_v25 = vsel %vm780_vm4, %v787_v33, %v789_v10  ;;  %vm527_vm7 = vweird.f32 %v4082_v35 }
 0x1af   :  { %v785_v0 = vsel %vm781_vm11, %v769_v53, %v784_v27  ;;  %v793_v12 = vsel %vm781_vm11, %v775_v9, %v792_v23  ;;  %v4872_v52 = vmul.u32.u64.low %v4825_v49, %v790_v25  ;;  %v4873_v39 = vmul.u32.u64.high %v4825_v49, %v790_v25, %v4872_v52 }
 0x1b0   :  { %vm2223_vm10 = vcmp.lt.s32.totalorder %v2222_v32, 2  ;;  %v1333_v37 = vsub.s32 0, %v4864_v28  ;;  %v794_v47 = vsel %vm780_vm4, %v791_v14, %v793_v12  ;;  %v1579_v2 = vand.u32 2147483647, %v4298_v29 }
 0x1b1   :  { %v1353_v5 = vsub.s32 4, %v1329_v63  ;;  %v4881_v6 = vmul.u32.u64.low %v4825_v49, %v794_v47  ;;  %v4882_v36 = vmul.u32.u64.high %v4825_v49, %v794_v47, %v4881_v6  ;;  %v1589_v11 = vadd.s32 1, %v3688_v41 }
 0x1b2   :  { %v3907_v1 = vpop.eup %3906  ;;  %vm2224_vm8 = vcmp.eq.s32.totalorder %v2222_v32, 0  ;;  %vm2227_vm9 = vcmp.eq.s32.totalorder %v2222_v32, 2  ;;  %vm4886_vm12 = vcmp.le.f32.partialorder %v1267_v22, 0.7853982  ;;  %v3677_v21 = vmin.u32 %v1333_v37, %v4864_v28 }
 0x1b3   :  { %v786_v31 = vsel %vm780_vm4, %v783_v13, %v785_v0  ;;  %v3909_v7 = vpop.eup %3908  ;;  %vm530_vm13 = vcmp.lt.s32.totalorder %v529_v44, 2  ;;  %vm531_vm14 = vcmp.eq.s32.totalorder %v529_v44, 0  ;;  %v535_v45 = vxor.u32 2147483648, %v3907_v1 }
 0x1b4   :  { %v805_v40 = vadd.s32 1, %v4873_v39  ;;  %v532_v55 = vxor.u32 2147483648, %v3909_v7  ;;  %vm534_vm15 = vcmp.eq.s32.totalorder %v529_v44, 2  ;;  %v1335_v46 = vclz %v3677_v21 }
 0x1b5   :  { %vm1590_vm0 = vcmp.gt.s32.totalorder %v1589_v11, 0  ;;  %v536_v17 = vsel %vm534_vm15, %v535_v45, %v3909_v7  ;;  %v2229_v22 = vsel %vm2227_vm9, %v535_v45, %v3909_v7  ;;  %v1354_v43 = vsel %vm1269_vm6, %v1353_v5, %v1329_v63 }
 0x1b6   :  { %v802_v16 = vmul.u32 %v4825_v49, %v786_v31  ;;  %v533_v34 = vsel %vm531_vm14, %v3907_v1, %v532_v55  ;;  %v2226_v26 = vsel %vm2224_vm8, %v3907_v1, %v532_v55  ;;  %v3678_v53 = vadd.s32 4294967294, %v1335_v46 }
 0x1b7   :  { %vm804_vm1 = vc.u32 %v4882_v36, %v4872_v52  ;;  %v537_v24 = vsel %vm530_vm13, %v533_v34, %v536_v17  ;;  %v2230_v9 = vsel %vm2223_vm10, %v2226_v26, %v2229_v22  ;;  %v1591_v38 = vsel %vm1590_vm0, %v1589_v11, 0 }
 0x1b8   :  { %v806_v19 = vsel %vm804_vm1, %v805_v40, %v4873_v39  ;;  %v538_v33 = vsel %vm527_vm7, nan, %v537_v24  ;;  %v2231_v49 = vsel %vm527_vm7, nan, %v2230_v9  ;;  %vm3679_vm3 = vcmp.lt.s32.totalorder %v3678_v53, 0 }
 0x1b9   :  { %v807_v63 = vadd.s32 %v806_v19, %v802_v16  ;;  %v1893_v41 = vmul.f32 7.071068, %v538_v33  ;;  %v3573_v48 = vmul.f32 7.071068, %v2231_v49  ;;  %v1338_v27 = vsel %vm3679_vm3, 0, %v3678_v53 }
 0x1ba   :  { %v1323_v8 = vadd.s32 %v4816_v59, %v4813_v51  ;;  %v1339_v10 = vsub.s32 32, %v1338_v27  ;;  %v1343_v32 = vsub.s32 4294967266, %v1338_v27  ;;  %v1356_v23 = vsel %vm4886_vm12, 0, %v1354_v43 }
 0x1bb   :  { %v808_v14 = vadd.s32 536870912, %v807_v63  ;;  %1909 = vst [vmem:[#allocation2 + $0x20] sm:$0xff] %v1893_v41  ;;  %3589 = vst [vmem:[#allocation2 + $0x28] sm:$0xff] %v3573_v48  ;;  %v4913_v35 = vand.u32 8388607, %v1579_v2  ;;  %v1593_v44 = vand.u32 31, %v1591_v38  ;;  %v1340_v13 = vshll.u32 %v4864_v28, %v1338_v27 }
 0x1bc   :  { %v1341_v25 = vshrl.u32 %v1323_v8, %v1339_v10  ;;  %v1344_v0 = vadd.s32 127, %v1343_v32  ;;  %v4919_v47 = vadd.s32 3, %v1356_v23  ;;  %v4924_v21 = vand.u32 3, %v1356_v23 }
 0x1bd   :  { %v4916_v12 = vshrl.u32 %v808_v14, 30  ;;  %v1594_v51 = vsub.s32 32, %v1593_v44  ;;  %v1587_v5 = vor.u32 8388608, %v4913_v35  ;;  %v1596_v31 = vshll.u32 %v3970_v50, %v1593_v44 }
 0x1be   :  { %v1342_v59 = vor.u32 %v1341_v25, %v1340_v13  ;;  %v1345_v39 = vshll.u32 %v1344_v0, 23  ;;  %v1592_v7 = vshrl.u32 %v1591_v38, 5  ;;  %v1599_v45 = vshll.u32 %v3971_v54, %v1593_v44 }
 0x1bf   :  { %v810_v37 = vshll.u32 %v4916_v12, 30  ;;  %v1597_v6 = vshrl.u32 %v3971_v54, %v1594_v51  ;;  %v1600_v11 = vshrl.u32 %v3972_v56, %v1594_v51  ;;  %v1602_v40 = vshll.u32 %v3972_v56, %v1593_v44 }
 0x1c0   :  { %v1346_v1 = vor.u32 4788187, %v1345_v39  ;;  %v1603_v55 = vshrl.u32 %v3973_v58, %v1594_v51  ;;  %v1349_v17 = vcvt.s32.f32 %v1342_v59  ;;  %v1605_v34 = vshll.u32 %v3973_v58, %v1593_v44 }
 0x1c1   :  { %v4926_v28 = vsub.s32 %v807_v63, %v810_v37  ;;  %v1598_v43 = vor.u32 %v1597_v6, %v1596_v31  ;;  %v1601_v16 = vor.u32 %v1600_v11, %v1599_v45  ;;  %v1606_v26 = vshrl.u32 %v3974_v60, %v1594_v51  ;;  %v4940_v63 = vpop.f32.mrb[7].mxu1 }
 0x1c2   :  { %v1347_v46 = vand.u32 2147483647, %v1346_v1  ;;  %v1609_v53 = vshrl.u32 %v3975_v3, %v1594_v51  ;;  %v803_v9 = vadd.s32 %v4872_v52, %v4882_v36  ;;  %v1608_v38 = vshll.u32 %v3974_v60, %v1593_v44 }
 0x1c3   :  { %v813_v22 = vsub.s32 0, %v4926_v28  ;;  %v1604_v33 = vor.u32 %v1603_v55, %v1602_v40  ;;  %v1607_v49 = vor.u32 %v1606_v26, %v1605_v34  ;;  %vm1611_vm5 = vcmp.lt.s32.totalorder %v1592_v7, 1 }
 0x1c4   :  { %v1350_v24 = vmul.f32 %v1349_v17, %v1347_v46  ;;  %vm1612_vm2 = vcmp.lt.s32.totalorder %v1592_v7, 2  ;;  %vm749_vm11 = vcmp.lt.s32.totalorder %v4237_v4, 0  ;;  %v1595_v27 = vshrl.u32 %v3970_v50, %v1594_v51 }
 0x1c5   :  { %v3657_v19 = vmin.u32 %v813_v22, %v4926_v28  ;;  %v1610_v8 = vor.u32 %v1609_v53, %v1608_v38  ;;  %v833_v10 = vsub.s32 4, %v4916_v12  ;;  %vm1613_vm4 = vcmp.lt.s32.totalorder %v1592_v7, 3 }
 0x1c6   :  { %v1351_v41 = vxor.u32 2147483648, %v1350_v24  ;;  %vm1614_vm7 = vcmp.lt.s32.totalorder %v1592_v7, 4  ;;  %v1619_v52 = vsel %vm1611_vm5, %v1598_v43, %v1601_v16  ;;  %v1615_v14 = vsel %vm1611_vm5, %v1595_v27, %v1598_v43 }
 0x1c7   :  { %v815_v48 = vclz %v3657_v19  ;;  %v1620_v23 = vsel %vm1614_vm7, %v1607_v49, 920167782  ;;  %v1616_v44 = vsel %vm1614_vm7, %v1604_v33, 2102212464  ;;  %v1623_v25 = vsel %vm1611_vm5, %v1601_v16, %v1604_v33 }
 0x1c8   :  { %v1352_v36 = vsel %vm1269_vm6, %v1351_v41, %v1350_v24  ;;  %v1621_v13 = vsel %vm1613_vm4, %v1604_v33, %v1620_v23  ;;  %v1624_v51 = vsel %vm1614_vm7, %v1610_v8, 1326507024  ;;  %v1627_v37 = vshll.u32 %v1587_v5, 8 }
 0x1c9   :  { %v3658_v32 = vadd.s32 4294967294, %v815_v48  ;;  %v1355_v35 = vsel %vm4886_vm12, %v4107_v15, %v1352_v36  ;;  %v1622_v0 = vsel %vm1612_vm2, %v1619_v52, %v1621_v13  ;;  %v1625_v39 = vsel %vm1613_vm4, %v1607_v49, %v1624_v51 }
 0x1ca   :  { %3910 = vcosq.f32 %v1355_v35  ;;  %v1617_v42 = vsel %vm1613_vm4, %v1601_v16, %v1616_v44  ;;  %v1626_v1 = vsel %vm1612_vm2, %v1623_v25, %v1625_v39  ;;  %vm4967_vm6 = vcmp.le.f32.partialorder %v747_v61, 0.7853982 }
 0x1cb   :  { %vm3659_vm10 = vcmp.lt.s32.totalorder %v3658_v32, 0  ;;  %3912 = vsinq.f32 %v1355_v35  ;;  %v4958_v31 = vmul.u32.u64.low %v1627_v37, %v1626_v1  ;;  %v4959_v45 = vmul.u32.u64.high %v1627_v37, %v1626_v1, %v4958_v31 }
 0x1cc   :  { %v818_v59 = vsel %vm3659_vm10, 0, %v3658_v32  ;;  %v4961_v40 = vmul.u32.u64.low %v1627_v37, %v1622_v0  ;;  %v4962_v55 = vmul.u32.u64.high %v1627_v37, %v1622_v0, %v4961_v40  ;;  %v1361_v43 = vand.u32 3, %v4919_v47 }
 0x1cd   :  { %v819_v6 = vsub.s32 32, %v818_v59  ;;  %v823_v11 = vsub.s32 4294967266, %v818_v59  ;;  %v820_v5 = vshll.u32 %v4926_v28, %v818_v59  ;;  %v834_v16 = vsel %vm749_vm11, %v833_v10, %v4916_v12 }
 0x1ce   :  { %v1618_v34 = vsel %vm1612_vm2, %v1615_v14, %v1617_v42  ;;  %v646_v26 = vand.u32 2139095040, %v4468_v30  ;;  %vm3047_vm8 = vcmp.lt.s32.totalorder %v4924_v21, 2  ;;  %v643_v24 = vand.u32 2147483647, %v4468_v30 }
 0x1cf   :  { %v821_v17 = vshrl.u32 %v803_v9, %v819_v6  ;;  %v824_v22 = vadd.s32 127, %v823_v11  ;;  %vm1359_vm9 = vweird.f32 %v4107_v15  ;;  %vm3048_vm12 = vcmp.eq.s32.totalorder %v4924_v21, 0 }
 0x1d0   :  { %vm1636_vm13 = vc.u32 %v4959_v45, %v4961_v40  ;;  %v1637_v47 = vadd.s32 1, %v4962_v55  ;;  %v647_v12 = vshrl.u32 %v646_v26, 23  ;;  %vm3051_vm14 = vcmp.eq.s32.totalorder %v4924_v21, 2 }
 0x1d1   :  { %v822_v61 = vor.u32 %v821_v17, %v820_v5  ;;  %v825_v53 = vshll.u32 %v824_v22, 23  ;;  %v836_v7 = vsel %vm4967_vm6, 0, %v834_v16  ;;  %v1634_v9 = vmul.u32 %v1627_v37, %v1618_v34 }
 0x1d2   :  { %vm1362_vm15 = vcmp.lt.s32.totalorder %v1361_v43, 2  ;;  %vm1363_vm0 = vcmp.eq.s32.totalorder %v1361_v43, 0  ;;  %v1638_v19 = vsel %vm1636_vm13, %v1637_v47, %v4962_v55  ;;  %v3652_v38 = vadd.s32 4294967169, %v647_v12 }
 0x1d3   :  { %v826_v28 = vor.u32 4788187, %v825_v53  ;;  %vm1366_vm1 = vcmp.eq.s32.totalorder %v1361_v43, 2  ;;  %v829_v41 = vcvt.s32.f32 %v822_v61  ;;  %v1639_v48 = vadd.s32 %v1638_v19, %v1634_v9 }
 0x1d4   :  { %v3911_v33 = vpop.eup %3910  ;;  %v840_v10 = vadd.s32 3, %v836_v7  ;;  %v653_v52 = vadd.s32 1, %v3652_v38  ;;  %v1478_v36 = vand.u32 2139095040, %v4554_v18  ;;  %v4990_v23 = vand.u32 3, %v836_v7 }
 0x1d5   :  { %v827_v49 = vand.u32 2147483647, %v826_v28  ;;  %v3913_v27 = vpop.eup %3912  ;;  %v1367_v8 = vxor.u32 2147483648, %v3911_v33  ;;  %v1640_v35 = vadd.s32 536870912, %v1639_v48  ;;  %v650_v25 = vand.u32 8388607, %v643_v24 }
 0x1d6   :  { %v1364_v32 = vxor.u32 2147483648, %v3913_v27  ;;  %vm654_vm3 = vcmp.gt.s32.totalorder %v653_v52, 0  ;;  %v1479_v42 = vshrl.u32 %v1478_v36, 23  ;;  %v5014_v43 = vand.u32 3, %v840_v10 }
 0x1d7   :  { %v830_v14 = vmul.f32 %v829_v41, %v827_v49  ;;  %v1368_v44 = vsel %vm1366_vm1, %v1367_v8, %v3913_v27  ;;  %v3053_v13 = vsel %vm3051_vm14, %v1367_v8, %v3913_v27  ;;  %v4999_v39 = vshrl.u32 %v1640_v35, 30 }
 0x1d8   :  { %v1365_v0 = vsel %vm1363_vm0, %v3911_v33, %v1364_v32  ;;  %v3050_v51 = vsel %vm3048_vm12, %v3911_v33, %v1364_v32  ;;  %v655_v11 = vsel %vm654_vm3, %v653_v52, 0  ;;  %v1475_v15 = vand.u32 2147483647, %v4554_v18 }
 0x1d9   :  { %v831_v59 = vxor.u32 2147483648, %v830_v14  ;;  %v1369_v37 = vsel %vm1362_vm15, %v1365_v0, %v1368_v44  ;;  %v3054_v6 = vsel %vm3047_vm8, %v3050_v51, %v3053_v13  ;;  %v1642_v5 = vshll.u32 %v4999_v39, 30 }
 0x1da   :  { %v1370_v1 = vsel %vm1359_vm9, nan, %v1369_v37  ;;  %v3055_v31 = vsel %vm1359_vm9, nan, %v3054_v6  ;;  %v657_v34 = vand.u32 31, %v655_v11  ;;  %v3684_v26 = vadd.s32 4294967169, %v1479_v42 }
 0x1db   :  { %v832_v55 = vsel %vm749_vm11, %v831_v59, %v830_v14  ;;  %v1901_v17 = vmul.f32 7.071068, %v1370_v1  ;;  %v3581_v22 = vmul.f32 7.071068, %v3055_v31  ;;  %v5016_v16 = vsub.s32 %v1639_v48, %v1642_v5 }
 0x1dc   :  { %v835_v21 = vsel %vm4967_vm6, %v4237_v4, %v832_v55  ;;  %v651_v53 = vor.u32 8388608, %v650_v25  ;;  %v658_v47 = vsub.s32 32, %v657_v34  ;;  %v1635_v46 = vadd.s32 %v4961_v40, %v4959_v45 }
 0x1dd   :  { %3914 = vcosq.f32 %v835_v21  ;;  %1917 = vst [vmem:[#allocation2 + $0xa0] sm:$0xff] %v1901_v17  ;;  %3597 = vst [vmem:[#allocation2 + $0xa8] sm:$0xff] %v3581_v22  ;;  %v1645_v61 = vsub.s32 0, %v5016_v16  ;;  %vm846_vm5 = vcmp.eq.s32.totalorder %v5014_v43, 2  ;;  %vm2536_vm2 = vcmp.eq.s32.totalorder %v4990_v23, 2 }
 0x1de   :  { %3916 = vsinq.f32 %v835_v21  ;;  %v661_v28 = vshrl.u32 %v3971_v54, %v658_v47  ;;  %v664_v7 = vshrl.u32 %v3972_v56, %v658_v47  ;;  %v5029_v9 = vand.u32 8388607, %v1475_v15 }
 0x1df   :  { %v3689_v12 = vmin.u32 %v1645_v61, %v5016_v16  ;;  %vm843_vm11 = vcmp.eq.s32.totalorder %v5014_v43, 0  ;;  %vm2533_vm4 = vcmp.eq.s32.totalorder %v4990_v23, 0  ;;  %v5033_v19 = vshrl.u32 %v655_v11, 5 }
 0x1e0   :  { %v660_v45 = vshll.u32 %v3970_v50, %v657_v34  ;;  %v663_v40 = vshll.u32 %v3971_v54, %v657_v34  ;;  %v5037_v38 = vadd.s32 1, %v3684_v26  ;;  %vm842_vm7 = vcmp.lt.s32.totalorder %v5014_v43, 2 }
 0x1e1   :  { %vm2532_vm10 = vcmp.lt.s32.totalorder %v4990_v23, 2  ;;  %v1647_v33 = vclz %v3689_v12  ;;  %v666_v49 = vshll.u32 %v3972_v56, %v657_v34  ;;  %v667_v41 = vshrl.u32 %v3973_v58, %v658_v47 }
 0x1e2   :  { %v5043_v48 = vshll.u32 %v651_v53, 8  ;;  %vm839_vm6 = vweird.f32 %v4237_v4  ;;  %v1665_v27 = vsub.s32 4, %v4999_v39  ;;  %v659_v8 = vshrl.u32 %v3970_v50, %v658_v47 }
 0x1e3   :  { %v662_v10 = vor.u32 %v661_v28, %v660_v45  ;;  %v665_v52 = vor.u32 %v664_v7, %v663_v40  ;;  %v3690_v36 = vadd.s32 4294967294, %v1647_v33  ;;  %v668_v32 = vor.u32 %v667_v41, %v666_v49 }
 0x1e4   :  { %v669_v14 = vshll.u32 %v3973_v58, %v657_v34  ;;  %v670_v35 = vshrl.u32 %v3974_v60, %v658_v47  ;;  %vm1581_vm8 = vcmp.lt.s32.totalorder %v4298_v29, 0  ;;  %v672_v44 = vshll.u32 %v3974_v60, %v657_v34 }
 0x1e5   :  { %v673_v13 = vshrl.u32 %v3975_v3, %v658_v47  ;;  %vm675_vm9 = vcmp.lt.s32.totalorder %v5033_v19, 1  ;;  %vm676_vm12 = vcmp.lt.s32.totalorder %v5033_v19, 2  ;;  %vm1486_vm13 = vcmp.gt.s32.totalorder %v5037_v38, 0 }
 0x1e6   :  { %vm3691_vm14 = vcmp.lt.s32.totalorder %v3690_v36, 0  ;;  %v671_v0 = vor.u32 %v670_v35, %v669_v14  ;;  %vm677_vm15 = vcmp.lt.s32.totalorder %v5033_v19, 3  ;;  %vm678_vm0 = vcmp.lt.s32.totalorder %v5033_v19, 4 }
 0x1e7   :  { %v3915_v25 = vpop.eup %3914  ;;  %v1650_v37 = vsel %vm3691_vm14, 0, %v3690_v36  ;;  %v679_v6 = vsel %vm675_vm9, %v659_v8, %v662_v10  ;;  %v680_v11 = vsel %vm678_vm0, %v668_v32, 2102212464  ;;  %v674_v55 = vor.u32 %v673_v13, %v672_v44 }
 0x1e8   :  { %v3917_v51 = vpop.eup %3916  ;;  %v847_v59 = vxor.u32 2147483648, %v3915_v25  ;;  %v1651_v1 = vsub.s32 32, %v1650_v37  ;;  %v1655_v31 = vsub.s32 4294967266, %v1650_v37  ;;  %v1652_v22 = vshll.u32 %v5016_v16, %v1650_v37 }
 0x1e9   :  { %v844_v42 = vxor.u32 2147483648, %v3917_v51  ;;  %v681_v21 = vsel %vm677_vm15, %v665_v52, %v680_v11  ;;  %v683_v16 = vsel %vm675_vm9, %v662_v10, %v665_v52  ;;  %v684_v28 = vsel %vm678_vm0, %v671_v0, 920167782 }
 0x1ea   :  { %v848_v5 = vsel %vm846_vm5, %v847_v59, %v3917_v51  ;;  %v2538_v17 = vsel %vm2536_vm2, %v847_v59, %v3917_v51  ;;  %v1653_v61 = vshrl.u32 %v1635_v46, %v1651_v1  ;;  %v1656_v53 = vadd.s32 127, %v1655_v31 }
 0x1eb   :  { %v845_v34 = vsel %vm843_vm11, %v3915_v25, %v844_v42  ;;  %v2535_v26 = vsel %vm2533_vm4, %v3915_v25, %v844_v42  ;;  %v685_v23 = vsel %vm677_vm15, %v668_v32, %v684_v28  ;;  %v687_v49 = vsel %vm675_vm9, %v665_v52, %v668_v32 }
 0x1ec   :  { %v849_v47 = vsel %vm842_vm7, %v845_v34, %v848_v5  ;;  %v2539_v12 = vsel %vm2532_vm10, %v2535_v26, %v2538_v17  ;;  %v1654_v46 = vor.u32 %v1653_v61, %v1652_v22  ;;  %v1657_v40 = vshll.u32 %v1656_v53, 23 }
 0x1ed   :  { %v850_v7 = vsel %vm839_vm6, nan, %v849_v47  ;;  %v2540_v45 = vsel %vm839_vm6, nan, %v2539_v12  ;;  %v1666_v8 = vsel %vm1581_vm8, %v1665_v27, %v4999_v39  ;;  %v686_v10 = vsel %vm676_vm12, %v683_v16, %v685_v23 }
 0x1ee   :  { %v1896_v33 = vmul.f32 7.071068, %v850_v7  ;;  %v3576_v43 = vmul.f32 7.071068, %v2540_v45  ;;  %v1658_v41 = vor.u32 4788187, %v1657_v40  ;;  %v682_v36 = vsel %vm676_vm12, %v679_v6, %v681_v21 }
 0x1ef   :  { %v688_v4 = vsel %vm678_vm0, %v674_v55, 1326507024  ;;  %v5101_v52 = vmul.u32.u64.low %v5043_v48, %v686_v10  ;;  %v5102_v32 = vmul.u32.u64.high %v5043_v48, %v686_v10, %v5101_v52  ;;  %v1661_v27 = vcvt.s32.f32 %v1654_v46 }
 0x1f0   :  { %1912 = vst [vmem:[#allocation2 + $0x50] sm:$0xff] %v1896_v33  ;;  %3592 = vst [vmem:[#allocation2 + $0x58] sm:$0xff] %v3576_v43  ;;  %v689_v14 = vsel %vm677_vm15, %v671_v0, %v688_v4  ;;  %v1659_v39 = vand.u32 2147483647, %v1658_v41  ;;  %v1487_v44 = vsel %vm1486_vm13, %v5037_v38, 0  ;;  %v1483_v37 = vor.u32 8388608, %v5029_v9 }
 0x1f1   :  { %v690_v35 = vsel %vm676_vm12, %v687_v49, %v689_v14  ;;  %vm5112_vm1 = vcmp.le.f32.partialorder %v1579_v2, 0.7853982  ;;  %v1489_v51 = vand.u32 31, %v1487_v44  ;;  %v698_v6 = vmul.u32 %v5043_v48, %v682_v36 }
 0x1f2   :  { %v5117_v25 = vmul.u32.u64.low %v5043_v48, %v690_v35  ;;  %v5118_v0 = vmul.u32.u64.high %v5043_v48, %v690_v35, %v5117_v25  ;;  %v1662_v59 = vmul.f32 %v1661_v27, %v1659_v39  ;;  %v1668_v19 = vsel %vm5112_vm1, 0, %v1666_v8 }
 0x1f3   :  { %v701_v38 = vadd.s32 1, %v5102_v32  ;;  %v5125_v11 = vshrl.u32 %v1487_v44, 5  ;;  %v1490_v2 = vsub.s32 32, %v1489_v51  ;;  %v1492_v1 = vshll.u32 %v3970_v50, %v1489_v51 }
 0x1f4   :  { %v1663_v42 = vxor.u32 2147483648, %v1662_v59  ;;  %v1495_v31 = vshll.u32 %v3971_v54, %v1489_v51  ;;  %v1498_v55 = vshll.u32 %v3972_v56, %v1489_v51  ;;  %vm700_vm3 = vc.u32 %v5118_v0, %v5101_v52 }
 0x1f5   :  { %v1493_v5 = vshrl.u32 %v3971_v54, %v1490_v2  ;;  %v1501_v9 = vshll.u32 %v3973_v58, %v1489_v51  ;;  %v1504_v48 = vshll.u32 %v3974_v60, %v1489_v51  ;;  %v702_v22 = vsel %vm700_vm3, %v701_v38, %v5102_v32 }
 0x1f6   :  { %v1664_v17 = vsel %vm1581_vm8, %v1663_v42, %v1662_v59  ;;  %v1496_v21 = vshrl.u32 %v3972_v56, %v1490_v2  ;;  %v1499_v34 = vshrl.u32 %v3973_v58, %v1490_v2  ;;  %v703_v61 = vadd.s32 %v702_v22, %v698_v6 }
 0x1f7   :  { %v1667_v26 = vsel %vm5112_vm1, %v4298_v29, %v1664_v17  ;;  %v1494_v53 = vor.u32 %v1493_v5, %v1492_v1  ;;  %v1502_v47 = vshrl.u32 %v3974_v60, %v1490_v2  ;;  %v1505_v28 = vshrl.u32 %v3975_v3, %v1490_v2 }
 0x1f8   :  { %3918 = vcosq.f32 %v1667_v26  ;;  %v1497_v12 = vor.u32 %v1496_v21, %v1495_v31  ;;  %v1500_v16 = vor.u32 %v1499_v34, %v1498_v55  ;;  %v704_v7 = vadd.s32 536870912, %v703_v61 }
 0x1f9   :  { %3920 = vsinq.f32 %v1667_v26  ;;  %v1503_v45 = vor.u32 %v1502_v47, %v1501_v9  ;;  %v5145_v46 = vshll.u32 %v1483_v37, 8  ;;  %v1672_v40 = vadd.s32 3, %v1668_v19 }
 0x1fa   :  { %v3355_v33 = vand.u32 3, %v1668_v19  ;;  %v1506_v43 = vor.u32 %v1505_v28, %v1504_v48  ;;  %v958_v23 = vand.u32 2139095040, %v4636_v20  ;;  %v5148_v49 = vshrl.u32 %v704_v7, 30 }
 0x1fb   :  { %vm1507_vm5 = vcmp.lt.s32.totalorder %v5125_v11, 1  ;;  %vm1509_vm2 = vcmp.lt.s32.totalorder %v5125_v11, 3  ;;  %vm1510_vm11 = vcmp.lt.s32.totalorder %v5125_v11, 4  ;;  %v1491_v14 = vshrl.u32 %v3970_v50, %v1490_v2 }
 0x1fc   :  { %v1515_v41 = vsel %vm1507_vm5, %v1494_v53, %v1497_v12  ;;  %v1516_v8 = vsel %vm1510_vm11, %v1503_v45, 920167782  ;;  %v1519_v10 = vsel %vm1507_vm5, %v1497_v12, %v1500_v16  ;;  %v1520_v4 = vsel %vm1510_vm11, %v1506_v43, 1326507024 }
 0x1fd   :  { %v706_v36 = vshll.u32 %v5148_v49, 30  ;;  %v1512_v32 = vsel %vm1510_vm11, %v1500_v16, 2102212464  ;;  %v1517_v39 = vsel %vm1509_vm2, %v1500_v16, %v1516_v8  ;;  %v1673_v27 = vand.u32 3, %v1672_v40 }
 0x1fe   :  { %vm1508_vm4 = vcmp.lt.s32.totalorder %v5125_v11, 2  ;;  %v1521_v35 = vsel %vm1509_vm2, %v1503_v45, %v1520_v4  ;;  %v959_v44 = vshrl.u32 %v958_v23, 23  ;;  %v1511_v25 = vsel %vm1507_vm5, %v1491_v14, %v1494_v53 }
 0x1ff   :  { %v5164_v13 = vsub.s32 %v703_v61, %v706_v36  ;;  %v1518_v51 = vsel %vm1508_vm4, %v1515_v41, %v1517_v39  ;;  %v1522_v59 = vsel %vm1508_vm4, %v1519_v10, %v1521_v35  ;;  %v1513_v19 = vsel %vm1509_vm2, %v1497_v12, %v1512_v32 }
 0x200   :  { %v5175_v37 = vmul.u32.u64.low %v5145_v46, %v1522_v59  ;;  %v5176_v6 = vmul.u32.u64.high %v5145_v46, %v1522_v59, %v5175_v37  ;;  %v3664_v38 = vadd.s32 4294967169, %v959_v44  ;;  %vm1671_vm7 = vweird.f32 %v4298_v29 }
 0x201   :  { %v709_v2 = vsub.s32 0, %v5164_v13  ;;  %vm3356_vm10 = vcmp.lt.s32.totalorder %v3355_v33, 2  ;;  %v5181_v1 = vmul.u32.u64.low %v5145_v46, %v1518_v51  ;;  %v5182_v31 = vmul.u32.u64.high %v5145_v46, %v1518_v51, %v5181_v1 }
 0x202   :  { %v3919_v42 = vpop.eup %3918  ;;  %vm3357_vm6 = vcmp.eq.s32.totalorder %v3355_v33, 0  ;;  %v1514_v48 = vsel %vm1508_vm4, %v1511_v25, %v1513_v19  ;;  %vm1678_vm8 = vcmp.eq.s32.totalorder %v1673_v27, 2  ;;  %vm3360_vm9 = vcmp.eq.s32.totalorder %v3355_v33, 2 }
 0x203   :  { %v3921_v55 = vpop.eup %3920  ;;  %v1679_v5 = vxor.u32 2147483648, %v3919_v42  ;;  %v3653_v9 = vmin.u32 %v709_v2, %v5164_v13  ;;  %v965_v22 = vadd.s32 1, %v3664_v38  ;;  %vm1675_vm12 = vcmp.eq.s32.totalorder %v1673_v27, 0 }
 0x204   :  { %v1676_v17 = vxor.u32 2147483648, %v3921_v55  ;;  %vm1674_vm13 = vcmp.lt.s32.totalorder %v1673_v27, 2  ;;  %v1530_v47 = vmul.u32 %v5145_v46, %v1514_v48  ;;  %vm1532_vm14 = vc.u32 %v5176_v6, %v5181_v1 }
 0x205   :  { %v1680_v21 = vsel %vm1678_vm8, %v1679_v5, %v3921_v55  ;;  %v3362_v34 = vsel %vm3360_vm9, %v1679_v5, %v3921_v55  ;;  %v711_v26 = vclz %v3653_v9  ;;  %v1533_v45 = vadd.s32 1, %v5182_v31 }
 0x206   :  { %v1677_v61 = vsel %vm1675_vm12, %v3919_v42, %v1676_v17  ;;  %v3359_v53 = vsel %vm3357_vm6, %v3919_v42, %v1676_v17  ;;  %vm966_vm15 = vcmp.gt.s32.totalorder %v965_v22, 0  ;;  %v955_v41 = vand.u32 2147483647, %v4636_v20 }
 0x207   :  { %v1681_v12 = vsel %vm1674_vm13, %v1677_v61, %v1680_v21  ;;  %v3363_v16 = vsel %vm3356_vm10, %v3359_v53, %v3362_v34  ;;  %v3654_v28 = vadd.s32 4294967294, %v711_v26  ;;  %v967_v46 = vsel %vm966_vm15, %v965_v22, 0 }
 0x208   :  { %v1682_v11 = vsel %vm1671_vm7, nan, %v1681_v12  ;;  %v3364_v7 = vsel %vm1671_vm7, nan, %v3363_v16  ;;  %v1534_v33 = vsel %vm1532_vm14, %v1533_v45, %v5182_v31  ;;  %v969_v8 = vand.u32 31, %v967_v46 }
 0x209   :  { %v1904_v40 = vmul.f32 7.071068, %v1682_v11  ;;  %v3584_v43 = vmul.f32 7.071068, %v3364_v7  ;;  %vm3655_vm0 = vcmp.lt.s32.totalorder %v3654_v28, 0  ;;  %v699_v10 = vadd.s32 %v5101_v52, %v5118_v0 }
 0x20a   :  { %v714_v23 = vsel %vm3655_vm0, 0, %v3654_v28  ;;  %v1535_v36 = vadd.s32 %v1534_v33, %v1530_v47  ;;  %vm5203_vm1 = vcmp.le.f32.partialorder %v643_v24, 0.7853982  ;;  %v729_v32 = vsub.s32 4, %v5148_v49 }
 0x20b   :  { %1920 = vst [vmem:[#allocation2 + $0xd0] sm:$0xff] %v1904_v40  ;;  %3600 = vst [vmem:[#allocation2 + $0xd8] sm:$0xff] %v3584_v43  ;;  %v715_v29 = vsub.s32 32, %v714_v23  ;;  %v719_v4 = vsub.s32 4294967266, %v714_v23  ;;  %v970_v39 = vsub.s32 32, %v969_v8  ;;  %v716_v27 = vshll.u32 %v5164_v13, %v714_v23 }
 0x20c   :  { %v1536_v25 = vadd.s32 536870912, %v1535_v36  ;;  %vm645_vm3 = vcmp.lt.s32.totalorder %v4468_v30, 0  ;;  %v962_v52 = vand.u32 8388607, %v955_v41  ;;  %v972_v13 = vshll.u32 %v3970_v50, %v969_v8 }
 0x20d   :  { %v717_v35 = vshrl.u32 %v699_v10, %v715_v29  ;;  %v720_v44 = vadd.s32 127, %v719_v4  ;;  %v973_v0 = vshrl.u32 %v3971_v54, %v970_v39  ;;  %v976_v24 = vshrl.u32 %v3972_v56, %v970_v39 }
 0x20e   :  { %v5214_v19 = vshrl.u32 %v1536_v25, 30  ;;  %v982_v37 = vshrl.u32 %v3974_v60, %v970_v39  ;;  %v975_v38 = vshll.u32 %v3971_v54, %v969_v8  ;;  %v979_v2 = vshrl.u32 %v3973_v58, %v970_v39 }
 0x20f   :  { %v718_v51 = vor.u32 %v717_v35, %v716_v27  ;;  %v721_v59 = vshll.u32 %v720_v44, 23  ;;  %v981_v42 = vshll.u32 %v3973_v58, %v969_v8  ;;  %v730_v55 = vsel %vm645_vm3, %v729_v32, %v5148_v49 }
 0x210   :  { %v1538_v5 = vshll.u32 %v5214_v19, 30  ;;  %v968_v9 = vshrl.u32 %v967_v46, 5  ;;  %v974_v48 = vor.u32 %v973_v0, %v972_v13  ;;  %v977_v17 = vor.u32 %v976_v24, %v975_v38 }
 0x211   :  { %v722_v31 = vor.u32 4788187, %v721_v59  ;;  %v978_v22 = vshll.u32 %v3972_v56, %v969_v8  ;;  %v983_v21 = vor.u32 %v982_v37, %v981_v42  ;;  %v725_v26 = vcvt.s32.f32 %v718_v51 }
 0x212   :  { %v5226_v61 = vsub.s32 %v1535_v36, %v1538_v5  ;;  %v985_v53 = vshrl.u32 %v3975_v3, %v970_v39  ;;  %v732_v47 = vsel %vm5203_vm1, 0, %v730_v55  ;;  %v963_v12 = vor.u32 8388608, %v962_v52 }
 0x213   :  { %v723_v34 = vand.u32 2147483647, %v722_v31  ;;  %v980_v16 = vor.u32 %v979_v2, %v978_v22  ;;  %v984_v11 = vshll.u32 %v3974_v60, %v969_v8  ;;  %vm990_vm5 = vcmp.lt.s32.totalorder %v968_v9, 4 }
 0x214   :  { %v1541_v28 = vsub.s32 0, %v5226_v61  ;;  %vm987_vm2 = vcmp.lt.s32.totalorder %v968_v9, 1  ;;  %vm989_vm11 = vcmp.lt.s32.totalorder %v968_v9, 3  ;;  %v996_v7 = vsel %vm990_vm5, %v983_v21, 920167782 }
 0x215   :  { %v726_v49 = vmul.f32 %v725_v26, %v723_v34  ;;  %v986_v43 = vor.u32 %v985_v53, %v984_v11  ;;  %v995_v46 = vsel %vm987_vm2, %v974_v48, %v977_v17  ;;  %v736_v23 = vadd.s32 3, %v732_v47 }
 0x216   :  { %v3685_v40 = vmin.u32 %v1541_v28, %v5226_v61  ;;  %v971_v33 = vshrl.u32 %v3970_v50, %v970_v39  ;;  %v992_v10 = vsel %vm990_vm5, %v980_v16, 2102212464  ;;  %v997_v29 = vsel %vm989_vm11, %v980_v16, %v996_v7 }
 0x217   :  { %v727_v45 = vxor.u32 2147483648, %v726_v49  ;;  %vm988_vm4 = vcmp.lt.s32.totalorder %v968_v9, 2  ;;  %v1003_v36 = vshll.u32 %v963_v12, 8  ;;  %vm1477_vm7 = vcmp.lt.s32.totalorder %v4554_v18, 0 }
 0x218   :  { %v1543_v4 = vclz %v3685_v40  ;;  %v991_v27 = vsel %vm987_vm2, %v971_v33, %v974_v48  ;;  %v998_v39 = vsel %vm988_vm4, %v995_v46, %v997_v29  ;;  %v999_v35 = vsel %vm987_vm2, %v977_v17, %v980_v16 }
 0x219   :  { %v728_v8 = vsel %vm645_vm3, %v727_v45, %v726_v49  ;;  %v993_v25 = vsel %vm989_vm11, %v977_v17, %v992_v10  ;;  %v1000_v52 = vsel %vm990_vm5, %v986_v43, 1326507024  ;;  %v2428_v51 = vand.u32 3, %v732_v47 }
 0x21a   :  { %v731_v32 = vsel %vm5203_vm1, %v4468_v30, %v728_v8  ;;  %v3686_v44 = vadd.s32 4294967294, %v1543_v4  ;;  %v1001_v0 = vsel %vm989_vm11, %v983_v21, %v1000_v52  ;;  %v1531_v59 = vadd.s32 %v5181_v1, %v5176_v6 }
 0x21b   :  { %3922 = vcosq.f32 %v731_v32  ;;  %v5251_v24 = vmul.u32.u64.low %v1003_v36, %v998_v39  ;;  %v5252_v14 = vmul.u32.u64.high %v1003_v36, %v998_v39, %v5251_v24  ;;  %v1002_v37 = vsel %vm988_vm4, %v999_v35, %v1001_v0 }
 0x21c   :  { %3924 = vsinq.f32 %v731_v32  ;;  %vm3687_vm10 = vcmp.lt.s32.totalorder %v3686_v44, 0  ;;  %v5258_v38 = vmul.u32.u64.low %v1003_v36, %v1002_v37  ;;  %v5259_v2 = vmul.u32.u64.high %v1003_v36, %v1002_v37, %v5258_v38 }
 0x21d   :  { %v1546_v13 = vsel %vm3687_vm10, 0, %v3686_v44  ;;  %v1790_v42 = vand.u32 2139095040, %v4709_v62  ;;  %v1561_v5 = vsub.s32 4, %v5214_v19  ;;  %v994_v48 = vsel %vm988_vm4, %v991_v27, %v993_v25 }
 0x21e   :  { %v1547_v31 = vsub.s32 32, %v1546_v13  ;;  %v1551_v55 = vsub.s32 4294967266, %v1546_v13  ;;  %v737_v17 = vand.u32 3, %v736_v23  ;;  %vm5266_vm6 = vcmp.le.f32.partialorder %v1475_v15, 0.7853982 }
 0x21f   :  { %v1013_v1 = vadd.s32 1, %v5252_v14  ;;  %v1791_v22 = vshrl.u32 %v1790_v42, 23  ;;  %vm2429_vm8 = vcmp.lt.s32.totalorder %v2428_v51, 2  ;;  %v1548_v21 = vshll.u32 %v5226_v61, %v1546_v13 }
 0x220   :  { %v1549_v34 = vshrl.u32 %v1531_v59, %v1547_v31  ;;  %v1552_v26 = vadd.s32 127, %v1551_v55  ;;  %vm735_vm9 = vweird.f32 %v4468_v30  ;;  %vm2430_vm12 = vcmp.eq.s32.totalorder %v2428_v51, 0 }
 0x221   :  { %v1010_v9 = vmul.u32 %v1003_v36, %v994_v48  ;;  %vm1012_vm13 = vc.u32 %v5259_v2, %v5251_v24  ;;  %v3696_v53 = vadd.s32 4294967169, %v1791_v22  ;;  %v1562_v12 = vsel %vm1477_vm7, %v1561_v5, %v5214_v19 }
 0x222   :  { %v1550_v15 = vor.u32 %v1549_v34, %v1548_v21  ;;  %v1553_v47 = vshll.u32 %v1552_v26, 23  ;;  %v1014_v16 = vsel %vm1012_vm13, %v1013_v1, %v5252_v14  ;;  %vm2433_vm14 = vcmp.eq.s32.totalorder %v2428_v51, 2 }
 0x223   :  { %v1015_v61 = vadd.s32 %v1014_v16, %v1010_v9  ;;  %v1787_v49 = vand.u32 2147483647, %v4709_v62  ;;  %v1797_v28 = vadd.s32 1, %v3696_v53  ;;  %vm738_vm15 = vcmp.lt.s32.totalorder %v737_v17, 2 }
 0x224   :  { %vm739_vm0 = vcmp.eq.s32.totalorder %v737_v17, 0  ;;  %vm742_vm1 = vcmp.eq.s32.totalorder %v737_v17, 2  ;;  %v1554_v7 = vor.u32 4788187, %v1553_v47  ;;  %v1564_v43 = vsel %vm5266_vm6, 0, %v1562_v12 }
 0x225   :  { %v3923_v11 = vpop.eup %3922  ;;  %v1016_v46 = vadd.s32 536870912, %v1015_v61  ;;  %vm1798_vm3 = vcmp.gt.s32.totalorder %v1797_v28, 0  ;;  %v1557_v33 = vcvt.s32.f32 %v1550_v15  ;;  %v1794_v36 = vand.u32 8388607, %v1787_v49 }
 0x226   :  { %v3925_v45 = vpop.eup %3924  ;;  %v743_v40 = vxor.u32 2147483648, %v3923_v11  ;;  %v1555_v23 = vand.u32 2147483647, %v1554_v7  ;;  %v1799_v10 = vsel %vm1798_vm3, %v1797_v28, 0  ;;  %v1568_v52 = vadd.s32 3, %v1564_v43 }
 0x227   :  { %v740_v19 = vxor.u32 2147483648, %v3925_v45  ;;  %v5283_v4 = vshrl.u32 %v1016_v46, 30  ;;  %v1801_v35 = vand.u32 31, %v1799_v10  ;;  %v1795_v51 = vor.u32 8388608, %v1794_v36 }
 0x228   :  { %v744_v29 = vsel %vm742_vm1, %v743_v40, %v3925_v45  ;;  %v2435_v8 = vsel %vm2433_vm14, %v743_v40, %v3925_v45  ;;  %v1558_v39 = vmul.f32 %v1557_v33, %v1555_v23  ;;  %v854_v5 = vand.u32 2139095040, %v4857_v57 }
 0x229   :  { %v741_v32 = vsel %vm739_vm0, %v3923_v11, %v740_v19  ;;  %v2432_v27 = vsel %vm2430_vm12, %v3923_v11, %v740_v19  ;;  %v1018_v0 = vshll.u32 %v5283_v4, 30  ;;  %v1802_v13 = vsub.s32 32, %v1801_v35 }
 0x22a   :  { %v745_v44 = vsel %vm738_vm15, %v741_v32, %v744_v29  ;;  %v2436_v25 = vsel %vm2429_vm8, %v2432_v27, %v2435_v8  ;;  %v1559_v37 = vxor.u32 2147483648, %v1558_v39  ;;  %v5304_v30 = vand.u32 3, %v1564_v43 }
 0x22b   :  { %v746_v14 = vsel %vm735_vm9, nan, %v745_v44  ;;  %v2437_v59 = vsel %vm735_vm9, nan, %v2436_v25  ;;  %v5296_v31 = vsub.s32 %v1015_v61, %v1018_v0  ;;  %v5307_v1 = vand.u32 3, %v1568_v52 }
 0x22c   :  { %v1895_v38 = vmul.f32 7.071068, %v746_v14  ;;  %v3575_v42 = vmul.f32 7.071068, %v2437_v59  ;;  %v1560_v55 = vsel %vm1477_vm7, %v1559_v37, %v1558_v39  ;;  %v1805_v22 = vshrl.u32 %v3971_v54, %v1802_v13 }
 0x22d   :  { %v1563_v48 = vsel %vm5266_vm6, %v4554_v18, %v1560_v55  ;;  %v1021_v17 = vsub.s32 0, %v5296_v31  ;;  %v1808_v21 = vshrl.u32 %v3972_v56, %v1802_v13  ;;  %v1804_v26 = vshll.u32 %v3970_v50, %v1801_v35 }
 0x22e   :  { %1911 = vst [vmem:[#allocation2 + $0x40] sm:$0xff] %v1895_v38  ;;  %3591 = vst [vmem:[#allocation2 + $0x48] sm:$0xff] %v3575_v42  ;;  %3926 = vcosq.f32 %v1563_v48  ;;  %v1807_v9 = vshll.u32 %v3971_v54, %v1801_v35  ;;  %v1011_v6 = vadd.s32 %v5251_v24, %v5259_v2  ;;  %v5316_v53 = vshrl.u32 %v1799_v10, 5 }
 0x22f   :  { %3928 = vsinq.f32 %v1563_v48  ;;  %v3665_v34 = vmin.u32 %v1021_v17, %v5296_v31  ;;  %v5318_v15 = vshll.u32 %v1795_v51, 8  ;;  %v5320_v47 = vshrl.u32 %v854_v5, 23 }
 0x230   :  { %v1041_v16 = vsub.s32 4, %v5283_v4  ;;  %v1806_v61 = vor.u32 %v1805_v22, %v1804_v26  ;;  %v1809_v28 = vor.u32 %v1808_v21, %v1807_v9  ;;  %vm1574_vm5 = vcmp.eq.s32.totalorder %v5307_v1, 2 }
 0x231   :  { %v1023_v12 = vclz %v3665_v34  ;;  %vm3257_vm2 = vcmp.eq.s32.totalorder %v5304_v30, 2  ;;  %v1810_v11 = vshll.u32 %v3972_v56, %v1801_v35  ;;  %v1811_v7 = vshrl.u32 %v3973_v58, %v1802_v13 }
 0x232   :  { %v1813_v24 = vshll.u32 %v3973_v58, %v1801_v35  ;;  %v1814_v2 = vshrl.u32 %v3974_v60, %v1802_v13  ;;  %vm1571_vm11 = vcmp.eq.s32.totalorder %v5307_v1, 0  ;;  %vm3254_vm4 = vcmp.eq.s32.totalorder %v5304_v30, 0 }
 0x233   :  { %vm957_vm7 = vcmp.lt.s32.totalorder %v4636_v20, 0  ;;  %v3666_v45 = vadd.s32 4294967294, %v1023_v12  ;;  %v1803_v40 = vshrl.u32 %v3970_v50, %v1802_v13  ;;  %v1816_v43 = vshll.u32 %v3974_v60, %v1801_v35 }
 0x234   :  { %v1817_v46 = vshrl.u32 %v3975_v3, %v1802_v13  ;;  %vm1570_vm10 = vcmp.lt.s32.totalorder %v5307_v1, 2  ;;  %vm3253_vm6 = vcmp.lt.s32.totalorder %v5304_v30, 2  ;;  %v1812_v19 = vor.u32 %v1811_v7, %v1810_v11 }
 0x235   :  { %v1815_v23 = vor.u32 %v1814_v2, %v1813_v24  ;;  %vm1819_vm8 = vcmp.lt.s32.totalorder %v5316_v53, 1  ;;  %vm1820_vm9 = vcmp.lt.s32.totalorder %v5316_v53, 2  ;;  %vm1567_vm12 = vweird.f32 %v4554_v18 }
 0x236   :  { %vm3667_vm13 = vcmp.lt.s32.totalorder %v3666_v45, 0  ;;  %v1818_v33 = vor.u32 %v1817_v46, %v1816_v43  ;;  %vm1821_vm14 = vcmp.lt.s32.totalorder %v5316_v53, 3  ;;  %vm1822_vm15 = vcmp.lt.s32.totalorder %v5316_v53, 4 }
 0x237   :  { %v1026_v10 = vsel %vm3667_vm13, 0, %v3666_v45  ;;  %v1824_v29 = vsel %vm1822_vm15, %v1812_v19, 2102212464  ;;  %v1827_v8 = vsel %vm1819_vm8, %v1806_v61, %v1809_v28  ;;  %v1828_v36 = vsel %vm1822_vm15, %v1815_v23, 920167782 }
 0x238   :  { %v1027_v32 = vsub.s32 32, %v1026_v10  ;;  %v1028_v27 = vshll.u32 %v5296_v31, %v1026_v10  ;;  %v1031_v39 = vsub.s32 4294967266, %v1026_v10  ;;  %v1823_v35 = vsel %vm1819_vm8, %v1803_v40, %v1806_v61  ;;  %v3927_v44 = vpop.eup %3926 }
 0x239   :  { %v1825_v25 = vsel %vm1821_vm14, %v1809_v28, %v1824_v29  ;;  %v1829_v52 = vsel %vm1821_vm14, %v1812_v19, %v1828_v36  ;;  %v1831_v0 = vsel %vm1819_vm8, %v1809_v28, %v1812_v19  ;;  %v1832_v14 = vsel %vm1822_vm15, %v1818_v33, 1326507024  ;;  %v3929_v59 = vpop.eup %3928 }
 0x23a   :  { %v1575_v37 = vxor.u32 2147483648, %v3927_v44  ;;  %v1029_v13 = vshrl.u32 %v1011_v6, %v1027_v32  ;;  %v1032_v38 = vadd.s32 127, %v1031_v39  ;;  %v1830_v42 = vsel %vm1820_vm9, %v1827_v8, %v1829_v52 }
 0x23b   :  { %v1572_v31 = vxor.u32 2147483648, %v3929_v59  ;;  %v1833_v55 = vsel %vm1821_vm14, %v1815_v23, %v1832_v14  ;;  %v5358_v51 = vmul.u32.u64.low %v5318_v15, %v1830_v42  ;;  %v5359_v5 = vmul.u32.u64.high %v5318_v15, %v1830_v42, %v5358_v51 }
 0x23c   :  { %v1576_v48 = vsel %vm1574_vm5, %v1575_v37, %v3929_v59  ;;  %v3259_v17 = vsel %vm3257_vm2, %v1575_v37, %v3929_v59  ;;  %v1030_v22 = vor.u32 %v1029_v13, %v1028_v27  ;;  %v1033_v21 = vshll.u32 %v1032_v38, 23 }
 0x23d   :  { %v1573_v34 = vsel %vm1571_vm11, %v3927_v44, %v1572_v31  ;;  %v3256_v26 = vsel %vm3254_vm4, %v3927_v44, %v1572_v31  ;;  %v1042_v9 = vsel %vm957_vm7, %v1041_v16, %v5283_v4  ;;  %v1834_v6 = vsel %vm1820_vm9, %v1831_v0, %v1833_v55 }
 0x23e   :  { %v1577_v12 = vsel %vm1570_vm10, %v1573_v34, %v1576_v48  ;;  %v3260_v61 = vsel %vm3253_vm6, %v3256_v26, %v3259_v17  ;;  %v1034_v28 = vor.u32 4788187, %v1033_v21  ;;  %v1826_v11 = vsel %vm1820_vm9, %v1823_v35, %v1825_v25 }
 0x23f   :  { %v1578_v7 = vsel %vm1567_vm12, nan, %v1577_v12  ;;  %v3261_v24 = vsel %vm1567_vm12, nan, %v3260_v61  ;;  %v5386_v4 = vmul.u32.u64.low %v5318_v15, %v1834_v6  ;;  %v5387_v16 = vmul.u32.u64.high %v5318_v15, %v1834_v6, %v5386_v4 }
 0x240   :  { %v1903_v2 = vmul.f32 7.071068, %v1578_v7  ;;  %v3583_v1 = vmul.f32 7.071068, %v3261_v24  ;;  %v1035_v45 = vand.u32 2147483647, %v1034_v28  ;;  %v1037_v40 = vcvt.s32.f32 %v1030_v22 }
 0x241   :  { %vm5391_vm0 = vcmp.le.f32.partialorder %v955_v41, 0.7853982  ;;  %v1845_v53 = vadd.s32 1, %v5359_v5  ;;  %v3660_v43 = vadd.s32 4294967169, %v5320_v47  ;;  %v851_v19 = vand.u32 2147483647, %v4857_v57 }
 0x242   :  { %1919 = vst [vmem:[#allocation2 + $0xc0] sm:$0xff] %v1903_v2  ;;  %3599 = vst [vmem:[#allocation2 + $0xc8] sm:$0xff] %v3583_v1  ;;  %v1038_v18 = vmul.f32 %v1037_v40, %v1035_v45  ;;  %v1044_v46 = vsel %vm5391_vm0, 0, %v1042_v9  ;;  %v1842_v23 = vmul.u32 %v5318_v15, %v1826_v11  ;;  %vm1844_vm1 = vc.u32 %v5387_v16, %v5358_v51 }
 0x243   :  { %v861_v41 = vadd.s32 1, %v3660_v43  ;;  %v1686_v33 = vand.u32 2139095040, %v4940_v63  ;;  %v1846_v29 = vsel %vm1844_vm1, %v1845_v53, %v5359_v5  ;;  %v1048_v36 = vadd.s32 3, %v1044_v46 }
 0x244   :  { %v1039_v10 = vxor.u32 2147483648, %v1038_v18  ;;  %v1847_v47 = vadd.s32 %v1846_v29, %v1842_v23  ;;  %v858_v32 = vand.u32 8388607, %v851_v19  ;;  %v5412_v25 = vand.u32 3, %v1044_v46 }
 0x245   :  { %vm862_vm3 = vcmp.gt.s32.totalorder %v861_v41, 0  ;;  %v1687_v44 = vshrl.u32 %v1686_v33, 23  ;;  %v1049_v14 = vand.u32 3, %v1048_v36  ;;  %vm1047_vm10 = vweird.f32 %v4636_v20 }
 0x246   :  { %v1040_v8 = vsel %vm957_vm7, %v1039_v10, %v1038_v18  ;;  %v863_v27 = vsel %vm862_vm3, %v861_v41, 0  ;;  %v1848_v39 = vadd.s32 536870912, %v1847_v47  ;;  %v859_v37 = vor.u32 8388608, %v858_v32 }
 0x247   :  { %v1043_v15 = vsel %vm5391_vm0, %v4636_v20, %v1040_v8  ;;  %v865_v35 = vand.u32 31, %v863_v27  ;;  %v3692_v38 = vadd.s32 4294967169, %v1687_v44  ;;  %vm2742_vm5 = vcmp.eq.s32.totalorder %v5412_v25, 2 }
 0x248   :  { %3930 = vcosq.f32 %v1043_v15  ;;  %v5414_v52 = vshrl.u32 %v1848_v39, 30  ;;  %vm2739_vm2 = vcmp.eq.s32.totalorder %v5412_v25, 0  ;;  %v5426_v17 = vshrl.u32 %v863_v27, 5 }
 0x249   :  { %3932 = vsinq.f32 %v1043_v15  ;;  %v866_v0 = vsub.s32 32, %v865_v35  ;;  %v877_v55 = vshll.u32 %v3973_v58, %v865_v35  ;;  %v868_v22 = vshll.u32 %v3970_v50, %v865_v35 }
 0x24a   :  { %v1850_v59 = vshll.u32 %v5414_v52, 30  ;;  %v871_v21 = vshll.u32 %v3971_v54, %v865_v35  ;;  %vm1050_vm11 = vcmp.lt.s32.totalorder %v1049_v14, 2  ;;  %vm1051_vm4 = vcmp.eq.s32.totalorder %v1049_v14, 0 }
 0x24b   :  { %v869_v13 = vshrl.u32 %v3971_v54, %v866_v0  ;;  %v872_v42 = vshrl.u32 %v3972_v56, %v866_v0  ;;  %v875_v31 = vshrl.u32 %v3973_v58, %v866_v0  ;;  %v878_v5 = vshrl.u32 %v3974_v60, %v866_v0 }
 0x24c   :  { %v5424_v48 = vsub.s32 %v1847_v47, %v1850_v59  ;;  %vm2738_vm7 = vcmp.lt.s32.totalorder %v5412_v25, 2  ;;  %v874_v34 = vshll.u32 %v3972_v56, %v865_v35  ;;  %v881_v9 = vshrl.u32 %v3975_v3, %v866_v0 }
 0x24d   :  { %v879_v26 = vor.u32 %v878_v5, %v877_v55  ;;  %vm1054_vm6 = vcmp.eq.s32.totalorder %v1049_v14, 2  ;;  %v870_v12 = vor.u32 %v869_v13, %v868_v22  ;;  %v873_v61 = vor.u32 %v872_v42, %v871_v21 }
 0x24e   :  { %v1853_v6 = vsub.s32 0, %v5424_v48  ;;  %v876_v28 = vor.u32 %v875_v31, %v874_v34  ;;  %v880_v11 = vshll.u32 %v3974_v60, %v865_v35  ;;  %v5436_v7 = vshll.u32 %v859_v37, 8 }
 0x24f   :  { %v1683_v24 = vand.u32 2147483647, %v4940_v63  ;;  %v1843_v4 = vadd.s32 %v5358_v51, %v5387_v16  ;;  %vm886_vm8 = vcmp.lt.s32.totalorder %v5426_v17, 4  ;;  %v1693_v1 = vadd.s32 1, %v3692_v38 }
 0x250   :  { %v3697_v2 = vmin.u32 %v1853_v6, %v5424_v48  ;;  %v867_v40 = vshrl.u32 %v3970_v50, %v866_v0  ;;  %v882_v30 = vor.u32 %v881_v9, %v880_v11  ;;  %vm883_vm9 = vcmp.lt.s32.totalorder %v5426_v17, 1 }
 0x251   :  { %v892_v53 = vsel %vm886_vm8, %v879_v26, 920167782  ;;  %vm885_vm12 = vcmp.lt.s32.totalorder %v5426_v17, 3  ;;  %v891_v51 = vsel %vm883_vm9, %v870_v12, %v873_v61  ;;  %vm884_vm13 = vcmp.lt.s32.totalorder %v5426_v17, 2 }
 0x252   :  { %v3931_v45 = vpop.eup %3930  ;;  %v1855_v46 = vclz %v3697_v2  ;;  %v887_v23 = vsel %vm883_vm9, %v867_v40, %v870_v12  ;;  %v893_v41 = vsel %vm885_vm12, %v876_v28, %v892_v53  ;;  %v888_v47 = vsel %vm886_vm8, %v876_v28, 2102212464 }
 0x253   :  { %v3933_v43 = vpop.eup %3932  ;;  %v1055_v18 = vxor.u32 2147483648, %v3931_v45  ;;  %v894_v32 = vsel %vm884_vm13, %v891_v51, %v893_v41  ;;  %v895_v27 = vsel %vm883_vm9, %v873_v61, %v876_v28  ;;  %v896_v35 = vsel %vm886_vm8, %v882_v30, 1326507024 }
 0x254   :  { %v1052_v16 = vxor.u32 2147483648, %v3933_v43  ;;  %v3698_v29 = vadd.s32 4294967294, %v1855_v46  ;;  %v897_v37 = vsel %vm885_vm12, %v879_v26, %v896_v35  ;;  %v889_v25 = vsel %vm885_vm12, %v873_v61, %v888_v47 }
 0x255   :  { %v1056_v33 = vsel %vm1054_vm6, %v1055_v18, %v3933_v43  ;;  %v2744_v10 = vsel %vm2742_vm5, %v1055_v18, %v3933_v43  ;;  %v898_v31 = vsel %vm884_vm13, %v895_v27, %v897_v37  ;;  %v890_v9 = vsel %vm884_vm13, %v887_v23, %v889_v25 }
 0x256   :  { %v1053_v8 = vsel %vm1051_vm4, %v3931_v45, %v1052_v16  ;;  %v2741_v36 = vsel %vm2739_vm2, %v3931_v45, %v1052_v16  ;;  %vm3699_vm14 = vcmp.lt.s32.totalorder %v3698_v29, 0  ;;  %vm1694_vm15 = vcmp.gt.s32.totalorder %v1693_v1, 0 }
 0x257   :  { %v1057_v15 = vsel %vm1050_vm11, %v1053_v8, %v1056_v33  ;;  %v2745_v39 = vsel %vm2738_vm7, %v2741_v36, %v2744_v10  ;;  %v1858_v59 = vsel %vm3699_vm14, 0, %v3698_v29  ;;  %v1695_v12 = vsel %vm1694_vm15, %v1693_v1, 0 }
 0x258   :  { %v1058_v44 = vsel %vm1047_vm10, nan, %v1057_v15  ;;  %v2746_v0 = vsel %vm1047_vm10, nan, %v2745_v39  ;;  %v1859_v38 = vsub.s32 32, %v1858_v59  ;;  %v1863_v42 = vsub.s32 4294967266, %v1858_v59 }
 0x259   :  { %v1898_v13 = vmul.f32 7.071068, %v1058_v44  ;;  %v3578_v14 = vmul.f32 7.071068, %v2746_v0  ;;  %v5483_v55 = vmul.u32.u64.low %v5436_v7, %v894_v32  ;;  %v5484_v5 = vmul.u32.u64.high %v5436_v7, %v894_v32, %v5483_v55 }
 0x25a   :  { %v1860_v20 = vshll.u32 %v5424_v48, %v1858_v59  ;;  %v1861_v22 = vshrl.u32 %v1843_v4, %v1859_v38  ;;  %v5489_v21 = vmul.u32.u64.low %v5436_v7, %v898_v31  ;;  %v5490_v34 = vmul.u32.u64.high %v5436_v7, %v898_v31, %v5489_v21 }
 0x25b   :  { %1914 = vst [vmem:[#allocation2 + $0x70] sm:$0xff] %v1898_v13  ;;  %3594 = vst [vmem:[#allocation2 + $0x78] sm:$0xff] %v3578_v14  ;;  %v1864_v26 = vadd.s32 127, %v1863_v42  ;;  %v909_v28 = vadd.s32 1, %v5484_v5  ;;  %v1697_v11 = vand.u32 31, %v1695_v12  ;;  %vm1789_vm0 = vcmp.lt.s32.totalorder %v4709_v62, 0 }
 0x25c   :  { %v1862_v6 = vor.u32 %v1861_v22, %v1860_v20  ;;  %v906_v48 = vmul.u32 %v5436_v7, %v890_v9  ;;  %vm908_vm1 = vc.u32 %v5490_v34, %v5483_v55  ;;  %v1690_v4 = vand.u32 8388607, %v1683_v24 }
 0x25d   :  { %v1865_v61 = vshll.u32 %v1864_v26, 23  ;;  %v1873_v17 = vsub.s32 4, %v5414_v52  ;;  %v910_v45 = vsel %vm908_vm1, %v909_v28, %v5484_v5  ;;  %v1698_v1 = vsub.s32 32, %v1697_v11 }
 0x25e   :  { %v1869_v40 = vcvt.s32.f32 %v1862_v6  ;;  %v911_v30 = vadd.s32 %v910_v45, %v906_v48  ;;  %v5503_v53 = vshrl.u32 %v1695_v12, 5  ;;  %v1700_v43 = vshll.u32 %v3970_v50, %v1697_v11 }
 0x25f   :  { %v1866_v2 = vor.u32 4788187, %v1865_v61  ;;  %v1701_v7 = vshrl.u32 %v3971_v54, %v1698_v1  ;;  %v1703_v46 = vshll.u32 %v3971_v54, %v1697_v11  ;;  %v1704_v51 = vshrl.u32 %v3972_v56, %v1698_v1 }
 0x260   :  { %v912_v16 = vadd.s32 536870912, %v911_v30  ;;  %v1707_v23 = vshrl.u32 %v3973_v58, %v1698_v1  ;;  %v1709_v41 = vshll.u32 %v3973_v58, %v1697_v11  ;;  %v1710_v33 = vshrl.u32 %v3974_v60, %v1698_v1 }
 0x261   :  { %v1867_v18 = vand.u32 2147483647, %v1866_v2  ;;  %v1874_v29 = vsel %vm1789_vm0, %v1873_v17, %v5414_v52  ;;  %v1706_v47 = vshll.u32 %v3972_v56, %v1697_v11  ;;  %v1713_v8 = vshrl.u32 %v3975_v3, %v1698_v1 }
 0x262   :  { %v5517_v36 = vshrl.u32 %v912_v16, 30  ;;  %v1702_v54 = vor.u32 %v1701_v7, %v1700_v43  ;;  %v1705_v32 = vor.u32 %v1704_v51, %v1703_v46  ;;  %v1711_v27 = vor.u32 %v1710_v33, %v1709_v41 }
 0x263   :  { %v1870_v10 = vmul.f32 %v1869_v40, %v1867_v18  ;;  %vm1788_vm3 = vcmp.le.f32.partialorder %v1787_v49, 0.7853982  ;;  %v1708_v15 = vor.u32 %v1707_v23, %v1706_v47  ;;  %v1712_v39 = vshll.u32 %v3974_v60, %v1697_v11 }
 0x264   :  { %v1876_v35 = vsel %vm1788_vm3, 0, %v1874_v29  ;;  %v914_v44 = vshll.u32 %v5517_v36, 30  ;;  %v1691_v52 = vor.u32 8388608, %v1690_v4  ;;  %vm1718_vm5 = vcmp.lt.s32.totalorder %v5503_v53, 4 }
 0x265   :  { %v1871_v58 = vxor.u32 2147483648, %v1870_v10  ;;  %v1714_v3 = vor.u32 %v1713_v8, %v1712_v39  ;;  %vm1715_vm2 = vcmp.lt.s32.totalorder %v5503_v53, 1  ;;  %v1724_v0 = vsel %vm1718_vm5, %v1711_v27, 920167782 }
 0x266   :  { %v915_v59 = vsub.s32 %v911_v30, %v914_v44  ;;  %vm1717_vm11 = vcmp.lt.s32.totalorder %v5503_v53, 3  ;;  %v1723_v60 = vsel %vm1715_vm2, %v1702_v54, %v1705_v32  ;;  %v1880_v13 = vadd.s32 3, %v1876_v35 }
 0x267   :  { %v1872_v56 = vsel %vm1789_vm0, %v1871_v58, %v1870_v10  ;;  %v1725_v37 = vsel %vm1717_vm11, %v1708_v15, %v1724_v0  ;;  %vm1716_vm4 = vcmp.lt.s32.totalorder %v5503_v53, 2  ;;  %v1728_v25 = vsel %vm1718_vm5, %v1714_v3, 1326507024 }
 0x268   :  { %v1875_v49 = vsel %vm1788_vm3, %v4709_v62, %v1872_v56  ;;  %v917_v14 = vsub.s32 0, %v915_v59  ;;  %v1726_v38 = vsel %vm1716_vm4, %v1723_v60, %v1725_v37  ;;  %v1731_v42 = vshll.u32 %v1691_v52, 8 }
 0x269   :  { %3934 = vcosq.f32 %v1875_v49  ;;  %v1727_v5 = vsel %vm1715_vm2, %v1705_v32, %v1708_v15  ;;  %v3561_v20 = vand.u32 3, %v1876_v35  ;;  %v1729_v22 = vsel %vm1717_vm11, %v1711_v27, %v1728_v25 }
 0x26a   :  { %3936 = vsinq.f32 %v1875_v49  ;;  %v3661_v31 = vmin.u32 %v917_v14, %v915_v59  ;;  %v5544_v21 = vmul.u32.u64.low %v1731_v42, %v1726_v38  ;;  %v5545_v26 = vmul.u32.u64.high %v1731_v42, %v1726_v38, %v5544_v21 }
 0x26b   :  { %v1881_v9 = vand.u32 3, %v1880_v13  ;;  %v1720_v12 = vsel %vm1718_vm5, %v1708_v15, 2102212464  ;;  %v1699_v61 = vshrl.u32 %v3970_v50, %v1698_v1  ;;  %v1730_v28 = vsel %vm1716_vm4, %v1727_v5, %v1729_v22 }
 0x26c   :  { %v919_v6 = vclz %v3661_v31  ;;  %v5553_v48 = vmul.u32.u64.low %v1731_v42, %v1730_v28  ;;  %v5554_v4 = vmul.u32.u64.high %v1731_v42, %v1730_v28, %v5553_v48  ;;  %vm1879_vm7 = vweird.f32 %v4709_v62 }
 0x26d   :  { %vm3562_vm10 = vcmp.lt.s32.totalorder %v3561_v20, 2  ;;  %v1719_v2 = vsel %vm1715_vm2, %v1699_v61, %v1702_v54  ;;  %v1721_v17 = vsel %vm1717_vm11, %v1705_v32, %v1720_v12  ;;  %vm1882_vm6 = vcmp.lt.s32.totalorder %v1881_v9, 2 }
 0x26e   :  { %v3662_v11 = vadd.s32 4294967294, %v919_v6  ;;  %vm3563_vm8 = vcmp.eq.s32.totalorder %v3561_v20, 0  ;;  %vm3566_vm9 = vcmp.eq.s32.totalorder %v3561_v20, 2  ;;  %vm1883_vm13 = vcmp.eq.s32.totalorder %v1881_v9, 0 }
 0x26f   :  { %v907_v45 = vadd.s32 %v5483_v55, %v5490_v34  ;;  %v1741_v40 = vadd.s32 1, %v5545_v26  ;;  %v1722_v46 = vsel %vm1716_vm4, %v1719_v2, %v1721_v17  ;;  %vm1886_vm14 = vcmp.eq.s32.totalorder %v1881_v9, 2 }
 0x270   :  { %vm3663_vm12 = vcmp.lt.s32.totalorder %v3662_v11, 0  ;;  %vm1740_vm15 = vc.u32 %v5554_v4, %v5544_v21  ;;  %v1738_v29 = vmul.u32 %v1731_v42, %v1722_v46  ;;  %vm853_vm0 = vcmp.lt.s32.totalorder %v4857_v57, 0 }
 0x271   :  { %v922_v1 = vsel %vm3663_vm12, 0, %v3662_v11  ;;  %v1742_v47 = vsel %vm1740_vm15, %v1741_v40, %v5545_v26  ;;  %vm852_vm1 = vcmp.le.f32.partialorder %v851_v19, 0.7853982  ;;  %v1739_v19 = vadd.s32 %v5544_v21, %v5554_v4 }
 0x272   :  { %v923_v18 = vsub.s32 32, %v922_v1  ;;  %v927_v7 = vsub.s32 4294967266, %v922_v1  ;;  %v924_v16 = vshll.u32 %v915_v59, %v922_v1  ;;  %v1743_v15 = vadd.s32 %v1742_v47, %v1738_v29 }
 0x273   :  { %v3935_v50 = vpop.eup %3934  ;;  %v937_v59 = vsub.s32 4, %v5517_v36 }
 0x274   :  { %v3937_v30 = vpop.eup %3936  ;;  %v1887_v43 = vxor.u32 2147483648, %v3935_v50  ;;  %v925_v55 = vshrl.u32 %v907_v45, %v923_v18  ;;  %v928_v34 = vadd.s32 127, %v927_v7  ;;  %v1744_v52 = vadd.s32 536870912, %v1743_v15 }
 0x275   :  { %v1884_v51 = vxor.u32 2147483648, %v3937_v30  ;;  %v938_v14 = vsel %vm853_vm0, %v937_v59, %v5517_v36 }
 0x276   :  { %v1888_v23 = vsel %vm1886_vm14, %v1887_v43, %v3937_v30  ;;  %v3568_v41 = vsel %vm3566_vm9, %v1887_v43, %v3937_v30  ;;  %v926_v54 = vor.u32 %v925_v55, %v924_v16  ;;  %v929_v32 = vshll.u32 %v928_v34, 23 }
 0x277   :  { %v1885_v33 = vsel %vm1883_vm13, %v3935_v50, %v1884_v51  ;;  %v3565_v10 = vsel %vm3563_vm8, %v3935_v50, %v1884_v51  ;;  %v5578_v0 = vshrl.u32 %v1744_v52, 30  ;;  %v940_v42 = vsel %vm852_vm1, 0, %v938_v14 }
 0x278   :  { %v1889_v53 = vsel %vm1882_vm6, %v1885_v33, %v1888_v23  ;;  %v3569_v8 = vsel %vm3562_vm10, %v3565_v10, %v3568_v41  ;;  %v930_v44 = vor.u32 4788187, %v929_v32  ;;  %v933_v3 = vcvt.s32.f32 %v926_v54 }
 0x279   :  { %v1890_v27 = vsel %vm1879_vm7, nan, %v1889_v53  ;;  %v3570_v58 = vsel %vm1879_vm7, nan, %v3569_v8  ;;  %v1746_v60 = vshll.u32 %v5578_v0, 30  ;;  %v944_v20 = vadd.s32 3, %v940_v42 }
 0x27a   :  { %v1906_v39 = vmul.f32 7.071068, %v1890_v27  ;;  %v3586_v35 = vmul.f32 7.071068, %v3570_v58  ;;  %v931_v56 = vand.u32 2147483647, %v930_v44  ;;  %vm943_vm6 = vweird.f32 %v4857_v57 }
 0x27b   :  { %v1747_v62 = vsub.s32 %v1743_v15, %v1746_v60  ;;  %v2634_v26 = vand.u32 3, %v940_v42  ;;  %v945_v9 = vand.u32 3, %v944_v20  ;;  %v1769_v33 = vsub.s32 4, %v5578_v0 }
 0x27c   :  { %1922 = vst [vmem:[#allocation2 + $0xf0] sm:$0xff] %v1906_v39  ;;  %3602 = vst [vmem:[#allocation2 + $0xf8] sm:$0xff] %v3586_v35  ;;  %v934_v49 = vmul.f32 %v933_v3, %v931_v56  ;;  %vm1685_vm8 = vcmp.lt.s32.totalorder %v4940_v63, 0  ;;  %vm1684_vm9 = vcmp.le.f32.partialorder %v1683_v24, 0.7853982 }
 0x27d   :  { %v1749_v25 = vsub.s32 0, %v1747_v62  ;;  %vm2636_vm5 = vcmp.eq.s32.totalorder %v2634_v26, 0  ;;  %vm947_vm2 = vcmp.eq.s32.totalorder %v945_v9, 0  ;;  %vm950_vm11 = vcmp.eq.s32.totalorder %v945_v9, 2 }
 0x27e   :  { %v935_v37 = vxor.u32 2147483648, %v934_v49  ;;  %vm2639_vm4 = vcmp.eq.s32.totalorder %v2634_v26, 2  ;;  %vm946_vm7 = vcmp.lt.s32.totalorder %v945_v9, 2  ;;  %vm2635_vm10 = vcmp.lt.s32.totalorder %v2634_v26, 2 }
 0x27f   :  { %v3693_v31 = vmin.u32 %v1749_v25, %v1747_v62  ;;  %v1770_v29 = vsel %vm1685_vm8, %v1769_v33, %v5578_v0 }
 0x280   :  { %v936_v13 = vsel %vm853_vm0, %v935_v37, %v934_v49  ;;  %v1772_v53 = vsel %vm1684_vm9, 0, %v1770_v29 }
 0x281   :  { %v939_v38 = vsel %vm852_vm1, %v4857_v57, %v936_v13  ;;  %v1751_v5 = vclz %v3693_v31  ;;  %v1776_v8 = vadd.s32 3, %v1772_v53  ;;  %v3458_v32 = vand.u32 3, %v1772_v53 }
 0x282   :  { %3938 = vcosq.f32 %v939_v38 }
 0x283   :  { %3940 = vsinq.f32 %v939_v38  ;;  %v3694_v22 = vadd.s32 4294967294, %v1751_v5  ;;  %v1777_v54 = vand.u32 3, %v1776_v8  ;;  %vm3463_vm13 = vcmp.eq.s32.totalorder %v3458_v32, 2 }
 0x284   :  { %vm3460_vm15 = vcmp.eq.s32.totalorder %v3458_v32, 0  ;;  %vm3459_vm1 = vcmp.lt.s32.totalorder %v3458_v32, 2 }
 0x285   :  { %vm3695_vm3 = vcmp.lt.s32.totalorder %v3694_v22, 0  ;;  %vm1782_vm12 = vcmp.eq.s32.totalorder %v1777_v54, 2  ;;  %vm1779_vm14 = vcmp.eq.s32.totalorder %v1777_v54, 0  ;;  %vm1778_vm0 = vcmp.lt.s32.totalorder %v1777_v54, 2 }
 0x286   :  { %v1754_v6 = vsel %vm3695_vm3, 0, %v3694_v22  ;;  %vm1775_vm3 = vweird.f32 %v4940_v63 }
 0x287   :  { %v1755_v12 = vsub.s32 32, %v1754_v6  ;;  %v1759_v61 = vsub.s32 4294967266, %v1754_v6  ;;  %v1756_v48 = vshll.u32 %v1747_v62, %v1754_v6 }
 0x289   :  { %v1757_v2 = vshrl.u32 %v1739_v19, %v1755_v12  ;;  %v1760_v17 = vadd.s32 127, %v1759_v61 }
 0x28b   :  { %v1758_v40 = vor.u32 %v1757_v2, %v1756_v48  ;;  %v1761_v30 = vshll.u32 %v1760_v17, 23 }
 0x28c   :  { %v3939_v36 = vpop.eup %3938 }
 0x28d   :  { %v3941_v28 = vpop.eup %3940  ;;  %v951_v11 = vxor.u32 2147483648, %v3939_v36  ;;  %v1762_v7 = vor.u32 4788187, %v1761_v30  ;;  %v1765_v55 = vcvt.s32.f32 %v1758_v40 }
 0x28e   :  { %v948_v50 = vxor.u32 2147483648, %v3941_v28 }
 0x28f   :  { %v952_v45 = vsel %vm950_vm11, %v951_v11, %v3941_v28  ;;  %v2641_v1 = vsel %vm2639_vm4, %v951_v11, %v3941_v28  ;;  %v1763_v41 = vand.u32 2147483647, %v1762_v7 }
 0x290   :  { %v949_v43 = vsel %vm947_vm2, %v3939_v36, %v948_v50  ;;  %v2638_v21 = vsel %vm2636_vm5, %v3939_v36, %v948_v50 }
 0x291   :  { %v953_v4 = vsel %vm946_vm7, %v949_v43, %v952_v45  ;;  %v2642_v18 = vsel %vm2635_vm10, %v2638_v21, %v2641_v1  ;;  %v1766_v34 = vmul.f32 %v1765_v55, %v1763_v41 }
 0x292   :  { %v954_v46 = vsel %vm943_vm6, nan, %v953_v4  ;;  %v2643_v51 = vsel %vm943_vm6, nan, %v2642_v18 }
 0x293   :  { %v1897_v16 = vmul.f32 7.071068, %v954_v46  ;;  %v3577_v23 = vmul.f32 7.071068, %v2643_v51  ;;  %v1767_v10 = vxor.u32 2147483648, %v1766_v34 }
 0x295   :  { %1913 = vst [vmem:[#allocation2 + $0x60] sm:$0xff] %v1897_v16  ;;  %3593 = vst [vmem:[#allocation2 + $0x68] sm:$0xff] %v3577_v23  ;;  %v1768_v57 = vsel %vm1685_vm8, %v1767_v10, %v1766_v34 }
 0x296   :  { %v1771_v47 = vsel %vm1684_vm9, %v4940_v63, %v1768_v57 }
 0x297   :  { %3942 = vcosq.f32 %v1771_v47 }
 0x298   :  { %3944 = vsinq.f32 %v1771_v47 }
 0x2a1   :  { %v3943_v27 = vpop.eup %3942 }
 0x2a2   :  { %v3945_v58 = vpop.eup %3944  ;;  %v1783_v15 = vxor.u32 2147483648, %v3943_v27 }
 0x2a3   :  { %v1780_v39 = vxor.u32 2147483648, %v3945_v58 }
 0x2a4   :  { %v1784_v35 = vsel %vm1782_vm12, %v1783_v15, %v3945_v58  ;;  %v3465_v24 = vsel %vm3463_vm13, %v1783_v15, %v3945_v58 }
 0x2a5   :  { %v1781_v44 = vsel %vm1779_vm14, %v3943_v27, %v1780_v39  ;;  %v3462_v52 = vsel %vm3460_vm15, %v3943_v27, %v1780_v39 }
 0x2a6   :  { %v1785_v56 = vsel %vm1778_vm0, %v1781_v44, %v1784_v35  ;;  %v3466_v3 = vsel %vm3459_vm1, %v3462_v52, %v3465_v24 }
 0x2a7   :  { %v1786_v0 = vsel %vm1775_vm3, nan, %v1785_v56  ;;  %v3467_v49 = vsel %vm1775_vm3, nan, %v3466_v3 }
 0x2a8   :  { %v1905_v59 = vmul.f32 7.071068, %v1786_v0  ;;  %v3585_v60 = vmul.f32 7.071068, %v3467_v49 }
 0x2aa   :  { %1921 = vst [vmem:[#allocation2 + $0xe0] sm:$0xff] %v1905_v59  ;;  %3601 = vst [vmem:[#allocation2 + $0xe8] sm:$0xff] %v3585_v60 }
 0x2ab   :  { %3957 = shalt.err (!%p3954_p4)
}
 0x2ac   :  { %s3958_s18 = scalar_lea.hbm %s5612_s2, 4096 }
 0x2ad   :  { %p3959_p5 = scmp.ne.s32.totalorder %s5612_s2, %s3958_s18  ;;  %p3962_p6 = scmp.lt.u32.totalorder %s3958_s18, %s5612_s2 }
 0x2af   :  { %p3964_p7 = pnand %p3962_p6, %p3959_p5 }
 0x2b1   :  { %3967 = shalt.err (!%p3964_p7)
}
 0x2b2   :  { %s3977_s22 = smov 256   ;;  %s3978_s23 = smov 16  }
 0x2b3   :  { %3614 = dma.vmem_to_hbm [thread:$0]  %s3609_s14, 4096, %s5612_s2, [#allocation3], %s3977_s22, %s3977_s22, %s3978_s23  }
 0x2b4   :  { %3968 = dma.done.wait [#allocation3], 4096  }
 0x2b5   :  { %3969 = vsyncadd [#allocation3], 4294963200 }
 0x2b6   :  { %3618 = vsyncpa [#allocation3], 1 }

</bundles_post_ra>
